<compile_context>
chip_gen: v7x
topology: tpu7x:2x2x1
jax: 0.10.0
libtpu: 0.0.40
codegen_flags: <defaults>
</compile_context>

<pallas_src>
import functools

import jax
import jax.numpy as jnp
from jax.experimental import pallas as pl
from jax.experimental.pallas import tpu as pltpu

# ----------------------- small synthetic configuration -----------------------
LAYER_COUNT = 2            # stands in for 24 (mega)
HEAD_COUNT = 4             # stands in for 32
EMBED = 32                 # stands in for 2048
HEAD_DIM = EMBED // HEAD_COUNT
GLU_EMBED = 64             # stands in for 4096
TEXT_VOCAB = 64            # stands in for 50272
TEXT_TOKENS = 8            # stands in for 64
IMAGE_VOCAB = 63           # stands in for 16415
IMAGE_TOKEN_COUNT = 16     # stands in for 256 (here a 4x4 VQ latent grid)
BOS_TOKEN = IMAGE_VOCAB    # analog of 2**14 - 1 (a valid id in the embed table)
VQ_HIDDEN = 8
VQ_DIM = 8
VQ_CODES = 32
EPS = 1e-5                 # torch.nn.LayerNorm default eps
ATTN_SCALE = 1.0 / (HEAD_DIM ** 0.5)

VMEM_LIMIT = 32 * 1024 * 1024        # explicit scoped-VMEM budget (safe on v5e..v7x)
CONV_TILE_BUDGET = 8 * 1024 * 1024   # conservative per-call tile budget (v5e default/2)


def _cparams(*sem):
    return pltpu.CompilerParams(dimension_semantics=sem,
                                vmem_limit_bytes=VMEM_LIMIT)


# ------------------------- in-kernel building blocks -------------------------
def _ln(x, g, b):
    mean = jnp.mean(x, axis=-1, keepdims=True)
    var = jnp.mean(jnp.square(x - mean), axis=-1, keepdims=True)
    return (x - mean) * jax.lax.rsqrt(var + EPS) * g + b


def _attend(q, k, v, bias, o_sc):
    """q (Q,E), k/v (K,E) f32 (per-head slices taken with static views).
    bias broadcastable to (Q,K).  Per-head softmax(QK^T)V written into the
    (Q,E) VMEM slab o_sc so the caller can do a single wide output matmul."""
    for h in range(HEAD_COUNT):
        sl = slice(h * HEAD_DIM, (h + 1) * HEAD_DIM)
        s = jnp.einsum('qc,kc->qk', q[:, sl], k[:, sl],
                       preferred_element_type=jnp.float32) + bias
        s = s - jnp.max(s, axis=-1, keepdims=True)
        e = jnp.exp(s)
        p = e * pl.reciprocal(jnp.sum(e, axis=-1, keepdims=True), approx=True)
        o_sc[:, sl] = jnp.dot(p, v[:, sl], preferred_element_type=jnp.float32)


def _mha_self(x, qkvw, ow, bias, o_sc):
    """Fused self-attention: one (T,E)x(E,3E) projection, per-head softmax,
    one (T,E)x(E,E) output projection.  q scale is pre-folded into qkvw."""
    x16 = x.astype(jnp.bfloat16)
    qkv = jnp.dot(x16, qkvw, preferred_element_type=jnp.float32)       # (T, 3E)
    q = qkv[:, :EMBED]
    k = qkv[:, EMBED:2 * EMBED]
    v = qkv[:, 2 * EMBED:]
    _attend(q, k, v, bias, o_sc)
    return jnp.dot(o_sc[...].astype(jnp.bfloat16), ow,
                   preferred_element_type=jnp.float32)


def _mha_cross(x, enc16, qw, kvw, ow, bias, o_sc):
    """Cross-attention: q from decoder stream, fused k|v from encoder state."""
    x16 = x.astype(jnp.bfloat16)
    q = jnp.dot(x16, qw, preferred_element_type=jnp.float32)           # (S, E)
    kv = jnp.dot(enc16, kvw, preferred_element_type=jnp.float32)       # (T, 2E)
    k = kv[:, :EMBED]
    v = kv[:, EMBED:]
    _attend(q, k, v, bias, o_sc)
    return jnp.dot(o_sc[...].astype(jnp.bfloat16), ow,
                   preferred_element_type=jnp.float32)


def _glu(x, g0g, g0b, f0, f1, g1g, g1b, f2):
    z = _ln(x, g0g, g0b)
    z16 = z.astype(jnp.bfloat16)
    w = jnp.dot(z16, f0, preferred_element_type=jnp.float32)
    v = jnp.dot(z16, f1, preferred_element_type=jnp.float32)
    w = 0.5 * w * (1.0 + jax.lax.erf(w * 0.7071067811865476))          # exact GELU
    z = _ln(w * v, g1g, g1b)
    return jnp.dot(z.astype(jnp.bfloat16), f2,
                   preferred_element_type=jnp.float32)


# ------------------------------ Pallas kernels -------------------------------
def _encoder_layer_kernel(x_ref, bias_ref, leg, leb, psg, psb, qkvw, ow, sag, sab,
                          g0g, g0b, f0, f1, g1g, g1b, f2, fng, fnb,
                          o_ref, x_sc, attn_sc):
    l = pl.program_id(1)

    @pl.when(l == 0)
    def _():
        x_sc[...] = _ln(x_ref[...], leg[...], leb[...])

    bias = bias_ref[...]                          # (1, T) pad-mask bias
    x = x_sc[...]
    res = x
    h = _ln(x, psg[...], psb[...])
    h = _mha_self(h, qkvw[...], ow[...], bias, attn_sc)
    h = _ln(h, sag[...], sab[...])
    x = res + h
    x = x + _glu(x, g0g[...], g0b[...], f0[...], f1[...],
                 g1g[...], g1b[...], f2[...])
    x_sc[...] = x

    @pl.when(l == pl.num_programs(1) - 1)
    def _():
        o_ref[...] = _ln(x, fng[...], fnb[...])


def _decoder_layer_kernel(x_ref, cb_ref, enc_ref, leg, leb,
                          psg, psb, sqkvw, sow, sag, sab,
                          pcg, pcb, cqw, ckvw, cow, cag, cab,
                          g0g, g0b, f0, f1, g1g, g1b, f2, fng, fnb,
                          o_ref, x_sc, attn_sc):
    l = pl.program_id(1)

    @pl.when(l == 0)
    def _():
        x_sc[...] = _ln(x_ref[...], leg[...], leb[...])

    s = x_sc.shape[0]
    qi = jax.lax.broadcasted_iota(jnp.int32, (s, s), 0)
    ki = jax.lax.broadcasted_iota(jnp.int32, (s, s), 1)
    causal = jnp.where(ki <= qi, jnp.float32(0.0), jnp.float32(-1e12))  # in-kernel
    cross = cb_ref[...]                           # (1, T) pad-mask bias
    enc16 = enc_ref[...].astype(jnp.bfloat16)     # cast once, reused per layer

    x = x_sc[...]
    # self attention
    res = x
    h = _ln(x, psg[...], psb[...])
    h = _mha_self(h, sqkvw[...], sow[...], causal, attn_sc)
    h = _ln(h, sag[...], sab[...])
    x = res + h
    # cross attention
    res = x
    h = _ln(x, pcg[...], pcb[...])
    h = _mha_cross(h, enc16, cqw[...], ckvw[...], cow[...], cross, attn_sc)
    h = _ln(h, cag[...], cab[...])
    x = res + h
    # GLU feed-forward
    x = x + _glu(x, g0g[...], g0b[...], f0[...], f1[...],
                 g1g[...], g1b[...], f2[...])
    x_sc[...] = x

    @pl.when(l == pl.num_programs(1) - 1)
    def _():
        o_ref[...] = _ln(x, fng[...], fnb[...])


def _lm_head_kernel(x_ref, w_ref, o_ref):
    o_ref[...] = jnp.dot(x_ref[...].astype(jnp.bfloat16), w_ref[...],
                         preferred_element_type=jnp.float32)


def _conv_matmul_kernel(x_ref, w_ref, b_ref, o_ref, *, apply_relu):
    # matmul with fused bias (+ ReLU) epilogue -- no separate bias/act round trip.
    y = jnp.dot(x_ref[...], w_ref[...],
                preferred_element_type=jnp.float32) + b_ref[...]
    if apply_relu:
        y = jnp.maximum(y, 0.0)
    o_ref[...] = y


def _conv_vq_kernel(x_ref, w_ref, b_ref, cbt_ref, idx_ref):
    # conv2 matmul+bias fused with the VQ nearest-codebook argmin.
    z = jnp.dot(x_ref[...], w_ref[...],
                preferred_element_type=jnp.float32) + b_ref[...]   # (M, D)
    cbt = cbt_ref[...]                                             # (D, K)
    # ||z||^2 dropped: argmin over codes is invariant to a per-row constant.
    e2 = jnp.sum(cbt * cbt, axis=0, keepdims=True)                 # (1, K)
    d = e2 - 2.0 * jnp.dot(z, cbt, preferred_element_type=jnp.float32)
    min_d = jnp.min(d, axis=-1, keepdims=True)
    iota = jax.lax.broadcasted_iota(jnp.int32, d.shape, 1)
    cand = jnp.where(d <= min_d, iota, jnp.int32(2 ** 30))         # first-min tie break
    idx = jnp.min(cand, axis=-1, keepdims=True)                    # (M, 1)
    # Lane-dense (tm, 128) staging -> unmasked vst; wrapper reads column 0.
    idx_ref[...] = jnp.broadcast_to(idx, idx_ref.shape)


# ------------------------------ spec helpers ----------------------------------
def _idx_b3(b, l):   # per-batch 3-D block, same for every layer step
    return (b, 0, 0)


def _idx_l3(b, l):   # per-layer 3-D weight block, same for every batch
    return (l, 0, 0)


def _idx_s2(b, l):   # shared small 2-D block
    return (0, 0)


def _largest_divisor(m, candidates):
    for t in candidates:
        if m % t == 0:
            return t
    return m


def _conv_row_tile(m, per_row_elems, resident_elems, budget_bytes=CONV_TILE_BUDGET):
    """Biggest row tile whose double-buffered tiles + resident weights fit budget."""
    for t in (512, 256, 128, 64, 32, 16, 8):
        if m % t:
            continue
        if 4 * (resident_elems + 2 * t * per_row_elems) <= budget_bytes:
            return t
    return m


# --------------------------- param layout (glue) ------------------------------
def _ln_vec(g, b):
    return (g.reshape(1, -1).astype(jnp.float32),
            b.reshape(1, -1).astype(jnp.float32))


def _stack_ln(layers, g_key, b_key, sub=None):
    def get(lp, k):
        return lp[sub][k] if sub is not None else lp[k]
    g = jnp.stack([get(lp, g_key) for lp in layers]).astype(jnp.float32)[:, None, :]
    b = jnp.stack([get(lp, b_key) for lp in layers]).astype(jnp.float32)[:, None, :]
    return g, b                                                    # (L, 1, D)


def _stack_fc(layers, key, sub=None):
    def get(lp):
        return lp[sub][key] if sub is not None else lp[key]
    # nn.Linear weight (out, in) -> (in, out); bf16 MXU operands, f32 accumulate.
    return jnp.stack([get(lp).T for lp in layers]).astype(jnp.bfloat16)


def _stack_qkv_fused(layers, sub):
    # q|k|v fused to (L, E, 3E); 1/sqrt(head_dim) query scale folded into q cols.
    ws = []
    for lp in layers:
        a = lp[sub]
        ws.append(jnp.concatenate(
            [a['q_w'].T * ATTN_SCALE, a['k_w'].T, a['v_w'].T], axis=1))
    return jnp.stack(ws).astype(jnp.bfloat16)                      # (L, E, 3E)


def _stack_kv_fused(layers, sub):
    ws = []
    for lp in layers:
        a = lp[sub]
        ws.append(jnp.concatenate([a['k_w'].T, a['v_w'].T], axis=1))
    return jnp.stack(ws).astype(jnp.bfloat16)                      # (L, E, 2E)


def _stack_q_scaled(layers, sub):
    return jnp.stack([lp[sub]['q_w'].T * ATTN_SCALE
                      for lp in layers]).astype(jnp.bfloat16)      # (L, E, E)


def _stack_out(layers, sub):
    return jnp.stack([lp[sub]['out_w'].T
                      for lp in layers]).astype(jnp.bfloat16)      # (L, E, E)


# ------------------------------ model sections --------------------------------
def encoder_forward(p, text_tokens):
    bsz, tlen = text_tokens.shape
    pad_bias = ((text_tokens == 1).astype(jnp.float32) * -1e12).reshape(bsz, 1, tlen)
    pos = jnp.arange(tlen, dtype=jnp.int32)
    x = (jnp.take(p['embed_tokens'], text_tokens, axis=0)
         + jnp.take(p['embed_positions'], pos, axis=0)[None]).astype(jnp.float32)

    layers = p['layers']
    leg, leb = _ln_vec(p['ln_emb_g'], p['ln_emb_b'])
    fng, fnb = _ln_vec(p['final_ln_g'], p['final_ln_b'])
    psg, psb = _stack_ln(layers, 'pre_sa_ln_g', 'pre_sa_ln_b')
    sag, sab = _stack_ln(layers, 'sa_ln_g', 'sa_ln_b')
    qkvw = _stack_qkv_fused(layers, 'self_attn')
    ow = _stack_out(layers, 'self_attn')
    g0g, g0b = _stack_ln(layers, 'ln0_g', 'ln0_b', sub='glu')
    g1g, g1b = _stack_ln(layers, 'ln1_g', 'ln1_b', sub='glu')
    f0 = _stack_fc(layers, 'fc0_w', sub='glu')
    f1 = _stack_fc(layers, 'fc1_w', sub='glu')
    f2 = _stack_fc(layers, 'fc2_w', sub='glu')

    in_specs = [
        pl.BlockSpec((None, tlen, EMBED), _idx_b3),        # x
        pl.BlockSpec((None, 1, tlen), _idx_b3),            # pad bias
        pl.BlockSpec((1, EMBED), _idx_s2),                 # leg
        pl.BlockSpec((1, EMBED), _idx_s2),                 # leb
        pl.BlockSpec((None, 1, EMBED), _idx_l3),           # psg
        pl.BlockSpec((None, 1, EMBED), _idx_l3),           # psb
        pl.BlockSpec((None, EMBED, 3 * EMBED), _idx_l3),   # qkvw
        pl.BlockSpec((None, EMBED, EMBED), _idx_l3),       # ow
        pl.BlockSpec((None, 1, EMBED), _idx_l3),           # sag
        pl.BlockSpec((None, 1, EMBED), _idx_l3),           # sab
        pl.BlockSpec((None, 1, EMBED), _idx_l3),           # g0g
        pl.BlockSpec((None, 1, EMBED), _idx_l3),           # g0b
        pl.BlockSpec((None, EMBED, GLU_EMBED), _idx_l3),   # f0
        pl.BlockSpec((None, EMBED, GLU_EMBED), _idx_l3),   # f1
        pl.BlockSpec((None, 1, GLU_EMBED), _idx_l3),       # g1g
        pl.BlockSpec((None, 1, GLU_EMBED), _idx_l3),       # g1b
        pl.BlockSpec((None, GLU_EMBED, EMBED), _idx_l3),   # f2
        pl.BlockSpec((1, EMBED), _idx_s2),                 # fng
        pl.BlockSpec((1, EMBED), _idx_s2),                 # fnb
    ]
    return pl.pallas_call(
        _encoder_layer_kernel,
        out_shape=jax.ShapeDtypeStruct((bsz, tlen, EMBED), jnp.float32),
        grid=(bsz, LAYER_COUNT),
        in_specs=in_specs,
        out_specs=pl.BlockSpec((None, tlen, EMBED), _idx_b3),
        scratch_shapes=[pltpu.VMEM((tlen, EMBED), jnp.float32),   # carried activation
                        pltpu.VMEM((tlen, EMBED), jnp.float32)],  # head-output slab
        compiler_params=_cparams("parallel", "arbitrary"),
    )(x, pad_bias, leg, leb, psg, psb, qkvw, ow, sag, sab,
      g0g, g0b, f0, f1, g1g, g1b, f2, fng, fnb)


def lm_head_forward(p, hidden):
    # final logits as their own vocab-tiled call (lane-dense stores; lm_head is
    # never a resident block inside the transformer kernel).
    b, s, e = hidden.shape
    x = hidden.reshape(b * s, e)
    w = p['lm_head_w'].T.astype(jnp.bfloat16)                      # (E, V)
    v = w.shape[1]
    m = b * s
    tm = _largest_divisor(m, (256, 128, 64, 32, 16, 8))
    tv = _largest_divisor(v, (2048, 1024, 512, 256, 128))
    out = pl.pallas_call(
        _lm_head_kernel,
        out_shape=jax.ShapeDtypeStruct((m, v), jnp.float32),
        grid=(m // tm, v // tv),
        in_specs=[pl.BlockSpec((tm, e), lambda i, j: (i, 0)),
                  pl.BlockSpec((e, tv), lambda i, j: (0, j))],
        out_specs=pl.BlockSpec((tm, tv), lambda i, j: (i, j)),
        compiler_params=_cparams("parallel", "parallel"),
    )(x, w)
    return out.reshape(b, s, v)


def decoder_forward(p, text_tokens, encoder_state, prev_tokens):
    bsz, s = prev_tokens.shape
    tlen = text_tokens.shape[1]
    pos = jnp.arange(s, dtype=jnp.int32)
    x = (jnp.take(p['embed_tokens'], prev_tokens, axis=0)
         + jnp.take(p['embed_positions'], pos, axis=0)[None]).astype(jnp.float32)
    cross_bias = ((text_tokens == 1).astype(jnp.float32) * -1e12).reshape(bsz, 1, tlen)

    layers = p['layers']
    leg, leb = _ln_vec(p['ln_emb_g'], p['ln_emb_b'])
    fng, fnb = _ln_vec(p['final_ln_g'], p['final_ln_b'])
    psg, psb = _stack_ln(layers, 'pre_sa_ln_g', 'pre_sa_ln_b')
    sag, sab = _stack_ln(layers, 'sa_ln_g', 'sa_ln_b')
    pcg, pcb = _stack_ln(layers, 'pre_ca_ln_g', 'pre_ca_ln_b')
    cag, cab = _stack_ln(layers, 'ca_ln_g', 'ca_ln_b')
    sqkvw = _stack_qkv_fused(layers, 'self_attn')
    sow = _stack_out(layers, 'self_attn')
    cqw = _stack_q_scaled(layers, 'cross_attn')
    ckvw = _stack_kv_fused(layers, 'cross_attn')
    cow = _stack_out(layers, 'cross_attn')
    g0g, g0b = _stack_ln(layers, 'ln0_g', 'ln0_b', sub='glu')
    g1g, g1b = _stack_ln(layers, 'ln1_g', 'ln1_b', sub='glu')
    f0 = _stack_fc(layers, 'fc0_w', sub='glu')
    f1 = _stack_fc(layers, 'fc1_w', sub='glu')
    f2 = _stack_fc(layers, 'fc2_w', sub='glu')

    in_specs = [
        pl.BlockSpec((None, s, EMBED), _idx_b3),           # x
        pl.BlockSpec((None, 1, tlen), _idx_b3),            # cross pad bias
        pl.BlockSpec((None, tlen, EMBED), _idx_b3),        # encoder state
        pl.BlockSpec((1, EMBED), _idx_s2),                 # leg
        pl.BlockSpec((1, EMBED), _idx_s2),                 # leb
        pl.BlockSpec((None, 1, EMBED), _idx_l3),           # psg
        pl.BlockSpec((None, 1, EMBED), _idx_l3),           # psb
        pl.BlockSpec((None, EMBED, 3 * EMBED), _idx_l3),   # self qkv
        pl.BlockSpec((None, EMBED, EMBED), _idx_l3),       # self out
        pl.BlockSpec((None, 1, EMBED), _idx_l3),           # sag
        pl.BlockSpec((None, 1, EMBED), _idx_l3),           # sab
        pl.BlockSpec((None, 1, EMBED), _idx_l3),           # pcg
        pl.BlockSpec((None, 1, EMBED), _idx_l3),           # pcb
        pl.BlockSpec((None, EMBED, EMBED), _idx_l3),       # cross q
        pl.BlockSpec((None, EMBED, 2 * EMBED), _idx_l3),   # cross kv
        pl.BlockSpec((None, EMBED, EMBED), _idx_l3),       # cross out
        pl.BlockSpec((None, 1, EMBED), _idx_l3),           # cag
        pl.BlockSpec((None, 1, EMBED), _idx_l3),           # cab
        pl.BlockSpec((None, 1, EMBED), _idx_l3),           # g0g
        pl.BlockSpec((None, 1, EMBED), _idx_l3),           # g0b
        pl.BlockSpec((None, EMBED, GLU_EMBED), _idx_l3),   # f0
        pl.BlockSpec((None, EMBED, GLU_EMBED), _idx_l3),   # f1
        pl.BlockSpec((None, 1, GLU_EMBED), _idx_l3),       # g1g
        pl.BlockSpec((None, 1, GLU_EMBED), _idx_l3),       # g1b
        pl.BlockSpec((None, GLU_EMBED, EMBED), _idx_l3),   # f2
        pl.BlockSpec((1, EMBED), _idx_s2),                 # fng
        pl.BlockSpec((1, EMBED), _idx_s2),                 # fnb
    ]
    hidden = pl.pallas_call(
        _decoder_layer_kernel,
        out_shape=jax.ShapeDtypeStruct((bsz, s, EMBED), jnp.float32),
        grid=(bsz, LAYER_COUNT),
        in_specs=in_specs,
        out_specs=pl.BlockSpec((None, s, EMBED), _idx_b3),
        scratch_shapes=[pltpu.VMEM((s, EMBED), jnp.float32),   # carried activation
                        pltpu.VMEM((s, EMBED), jnp.float32)],  # head-output slab
        compiler_params=_cparams("parallel", "arbitrary"),
    )(x, cross_bias, encoder_state.astype(jnp.float32), leg, leb,
      psg, psb, sqkvw, sow, sag, sab,
      pcg, pcb, cqw, ckvw, cow, cag, cab,
      g0g, g0b, f0, f1, g1g, g1b, f2, fng, fnb)
    # TODO(synk): at mega scale also tile the GLU hidden dim / add a query-row
    # parallel grid axis (v7x 2-TC feed); activations would then round-trip HBM
    # between layer steps instead of riding in the VMEM carry.
    return lm_head_forward(p, hidden)


# ------------------------------ VQGAN tokenizer --------------------------------
def _im2col(x, kh_, kw_, stride, pad):
    # TODO(synk): im2col patch extraction stays in XLA glue; at real VQGAN scale
    # the patches should be generated on the fly inside the matmul kernel.
    n, c, h, w = x.shape
    xp = jnp.pad(x, ((0, 0), (0, 0), (pad, pad), (pad, pad)))
    oh = (h + 2 * pad - kh_) // stride + 1
    ow = (w + 2 * pad - kw_) // stride + 1
    cols = []
    for kh in range(kh_):
        for kw in range(kw_):
            cols.append(xp[:, :, kh:kh + stride * oh:stride, kw:kw + stride * ow:stride])
    col = jnp.stack(cols, axis=2)                                  # (N,C,KH*KW,OH,OW)
    col = col.transpose(0, 3, 4, 1, 2).reshape(n * oh * ow, c * kh_ * kw_)
    return col, oh, ow


def pallas_matmul_bias_act(x, w, b, apply_relu):
    # TODO(synk): optionally run with bf16 operands (f32 accumulate) after a
    # tolerance check; kept f32 to match the autocast(enabled=False) region.
    m, k = x.shape
    n = w.shape[1]
    tm = _conv_row_tile(m, per_row_elems=k + n, resident_elems=k * n + n)
    kern = functools.partial(_conv_matmul_kernel, apply_relu=apply_relu)
    return pl.pallas_call(
        kern,
        out_shape=jax.ShapeDtypeStruct((m, n), jnp.float32),
        grid=(m // tm,),
        in_specs=[pl.BlockSpec((tm, k), lambda i: (i, 0)),
                  pl.BlockSpec((k, n), lambda i: (0, 0)),
                  pl.BlockSpec((1, n), lambda i: (0, 0))],
        out_specs=pl.BlockSpec((tm, n), lambda i: (i, 0)),
        compiler_params=_cparams("parallel"),
    )(x.astype(jnp.float32), w, b)


def pallas_conv_vq(x, w, b, cbt):
    m, k = x.shape
    d = w.shape[1]
    ncodes = cbt.shape[1]
    tm = _conv_row_tile(m, per_row_elems=k + 128,
                        resident_elems=k * d + d + d * ncodes)
    # TODO(synk): codebook axis is not tiled (K=32 here); the real 16384-code book
    # needs an inner K-tiled loop with a running (min, argmin) pair in scratch.
    idx = pl.pallas_call(
        _conv_vq_kernel,
        out_shape=jax.ShapeDtypeStruct((m, 128), jnp.int32),       # lane-dense indices
        grid=(m // tm,),
        in_specs=[pl.BlockSpec((tm, k), lambda i: (i, 0)),
                  pl.BlockSpec((k, d), lambda i: (0, 0)),
                  pl.BlockSpec((1, d), lambda i: (0, 0)),
                  pl.BlockSpec((d, ncodes), lambda i: (0, 0))],
        out_specs=pl.BlockSpec((tm, 128), lambda i: (i, 0)),
        compiler_params=_cparams("parallel"),
    )(x.astype(jnp.float32), w, b, cbt)
    return idx[:, 0]


def vqgan_tokenize(p, images):
    # TODO(synk): full taming-transformers VQGAN encoder (ResNet/attention blocks,
    # 16x downsample) is simplified to two strided convs + vector quantization.
    # This path stays f32, matching the autocast(enabled=False) region in PyTorch.
    n = images.shape[0]
    col1, oh1, ow1 = _im2col(images, 3, 3, stride=2, pad=1)
    w1 = p['conv1_w'].reshape(VQ_HIDDEN, -1).T.astype(jnp.float32)
    b1 = p['conv1_b'].reshape(1, -1).astype(jnp.float32)
    h = pallas_matmul_bias_act(col1, w1, b1, apply_relu=True)      # (N*OH*OW, C1)
    h = h.reshape(n, oh1, ow1, VQ_HIDDEN).transpose(0, 3, 1, 2)    # NCHW

    col2, oh2, ow2 = _im2col(h, 3, 3, stride=2, pad=1)
    w2 = p['conv2_w'].reshape(VQ_DIM, -1).T.astype(jnp.float32)
    b2 = p['conv2_b'].reshape(1, -1).astype(jnp.float32)
    cbt = p['codebook'].T.astype(jnp.float32)                      # (D, K)
    idx = pallas_conv_vq(col2, w2, b2, cbt)                        # (N*OH*OW,) int32
    return idx.reshape(n, oh2 * ow2)


# ------------------------------- full forward ---------------------------------
def min_dalle_forward(params, images, text_tokens, condition_state=None):
    """Mirrors MinDalle.forward (condition=False): returns (image_logits, image_tokens)."""
    del condition_state                                            # condition=False path
    image_count = text_tokens.shape[0]
    encoder_state = encoder_forward(params['encoder'], text_tokens)
    image_tokens = vqgan_tokenize(params['vqgan'], images)         # (B, IMAGE_TOKEN_COUNT)
    image_bos = jnp.full((image_count, 1), BOS_TOKEN, dtype=jnp.int32)
    image_input_tokens = jnp.concatenate([image_bos, image_tokens[:, :-1]], axis=-1)
    # attention_state (teacher-forcing KV cache) is written but never read in this
    # forward's outputs, so it is dropped instead of allocating/zero-filling it.
    image_logits = decoder_forward(params['decoder'], text_tokens, encoder_state,
                                   image_input_tokens)
    return image_logits, image_tokens


# --------------------------- deterministic params ----------------------------
def init_params(key):
    keys = iter(jax.random.split(key, 512))

    def nrm(shape, scale=0.02):
        return jax.random.normal(next(keys), shape, jnp.float32) * scale

    def ln(d):
        return jnp.ones((d,), jnp.float32), jnp.zeros((d,), jnp.float32)

    def attn_params():
        return dict(k_w=nrm((EMBED, EMBED)), v_w=nrm((EMBED, EMBED)),
                    q_w=nrm((EMBED, EMBED)), out_w=nrm((EMBED, EMBED)))

    def glu_params():
        g0, b0 = ln(EMBED)
        g1, b1 = ln(GLU_EMBED)
        return dict(ln0_g=g0, ln0_b=b0,
                    fc0_w=nrm((GLU_EMBED, EMBED)), fc1_w=nrm((GLU_EMBED, EMBED)),
                    ln1_g=g1, ln1_b=b1, fc2_w=nrm((EMBED, GLU_EMBED)))

    def enc_layer():
        pg, pb = ln(EMBED)
        sg, sb = ln(EMBED)
        return dict(pre_sa_ln_g=pg, pre_sa_ln_b=pb, self_attn=attn_params(),
                    sa_ln_g=sg, sa_ln_b=sb, glu=glu_params())

    def dec_layer():
        pg, pb = ln(EMBED)
        sg, sb = ln(EMBED)
        cg, cb = ln(EMBED)
        eg, eb = ln(EMBED)
        return dict(pre_sa_ln_g=pg, pre_sa_ln_b=pb, self_attn=attn_params(),
                    sa_ln_g=sg, sa_ln_b=sb,
                    pre_ca_ln_g=cg, pre_ca_ln_b=cb, cross_attn=attn_params(),
                    ca_ln_g=eg, ca_ln_b=eb, glu=glu_params())

    leg, leb = ln(EMBED)
    feg, feb = ln(EMBED)
    encoder = dict(embed_tokens=nrm((TEXT_VOCAB, EMBED)),
                   embed_positions=nrm((TEXT_TOKENS, EMBED)),
                   ln_emb_g=leg, ln_emb_b=leb,
                   layers=[enc_layer() for _ in range(LAYER_COUNT)],
                   final_ln_g=feg, final_ln_b=feb)

    ldg, ldb = ln(EMBED)
    fdg, fdb = ln(EMBED)
    decoder = dict(embed_tokens=nrm((IMAGE_VOCAB + 1, EMBED)),
                   embed_positions=nrm((IMAGE_TOKEN_COUNT, EMBED)),
                   ln_emb_g=ldg, ln_emb_b=ldb,
                   layers=[dec_layer() for _ in range(LAYER_COUNT)],
                   final_ln_g=fdg, final_ln_b=fdb,
                   lm_head_w=nrm((IMAGE_VOCAB + 1, EMBED)))

    vqgan = dict(conv1_w=nrm((VQ_HIDDEN, 3, 3, 3), 0.1),
                 conv1_b=jnp.zeros((VQ_HIDDEN,), jnp.float32),
                 conv2_w=nrm((VQ_DIM, VQ_HIDDEN, 3, 3), 0.1),
                 conv2_b=jnp.zeros((VQ_DIM,), jnp.float32),
                 codebook=nrm((VQ_CODES, VQ_DIM), 1.0))

    return dict(encoder=encoder, decoder=decoder, vqgan=vqgan)


# TODO(synk): tokenizer / file downloads / torch.manual_seed / the autoregressive
# sampling loop (generate_*, sample_*) are host-side control flow, not part of
# forward(), and are not translated.


if __name__ == "__main__":
    key = jax.random.PRNGKey(0)
    pkey, ikey, tkey = jax.random.split(key, 3)
    params = init_params(pkey)

    # images: NCHW float32 (as PyTorch expects); text tokens int ids, 1 == padding.
    images = jax.random.normal(ikey, (2, 3, 16, 16), jnp.float32)
    text_tokens = jax.random.randint(tkey, (2, TEXT_TOKENS), 2, TEXT_VOCAB).astype(jnp.int32)
    text_tokens = text_tokens.at[:, -2:].set(1)   # some padding so the mask path is exercised

    fwd = jax.jit(min_dalle_forward)
    image_logits, image_tokens = fwd(params, images, text_tokens)
    jax.block_until_ready((image_logits, image_tokens))

    assert image_logits.shape == (2, IMAGE_TOKEN_COUNT, IMAGE_VOCAB + 1)
    assert image_logits.dtype == jnp.float32
    assert image_tokens.shape == (2, IMAGE_TOKEN_COUNT)
    assert image_tokens.dtype == jnp.int32
    print("KERNEL_OK")
</pallas_src>

<mosaic_0001>
module attributes {stable_mosaic.version = 11 : i64} {
  func.func @_conv_matmul_kernel(%arg0: i32, %arg1: memref<128x27xf32, #tpu.memory_space<vmem>>, %arg2: memref<27x8xf32, #tpu.memory_space<vmem>>, %arg3: memref<1x8xf32, #tpu.memory_space<vmem>>, %arg4: memref<128x8xf32, #tpu.memory_space<vmem>>) attributes {dimension_semantics = [#tpu.dimension_semantics<parallel>], iteration_bounds = array<i64: 1>, scalar_prefetch = 0 : i64, scratch_operands = 0 : i64, tpu.core_type = #tpu.core_type<tc>, window_params = [{transform_indices = @transform_0, window_bounds = array<i64: 128, 27>}, {pipeline_mode = #tpu.pipeline_mode<synchronous>, transform_indices = @transform_1, window_bounds = array<i64: 27, 8>}, {pipeline_mode = #tpu.pipeline_mode<synchronous>, transform_indices = @transform_2, window_bounds = array<i64: 1, 8>}, {transform_indices = @transform_3, window_bounds = array<i64: 128, 8>}]} {
    %c0 = arith.constant 0 : index
    %c0_0 = arith.constant 0 : index
    %0 = vector.load %arg1[%c0, %c0_0] : memref<128x27xf32, #tpu.memory_space<vmem>>, vector<128x27xf32>
    %c0_1 = arith.constant 0 : index
    %c0_2 = arith.constant 0 : index
    %1 = vector.load %arg2[%c0_1, %c0_2] : memref<27x8xf32, #tpu.memory_space<vmem>>, vector<27x8xf32>
    %cst = arith.constant dense<0.000000e+00> : vector<128x8xf32>
    %2 = tpu.matmul %0, %1, %cst {dimension_numbers = #tpu.dot_dimension_numbers<[1], [0], [0], [1], [0, 0, 1, 1], [], []>} : vector<128x27xf32>, vector<27x8xf32>, vector<128x8xf32> -> vector<128x8xf32>
    %c0_3 = arith.constant 0 : index
    %c0_4 = arith.constant 0 : index
    %3 = vector.load %arg3[%c0_3, %c0_4] : memref<1x8xf32, #tpu.memory_space<vmem>>, vector<1x8xf32>
    %4 = vector.broadcast %3 : vector<1x8xf32> to vector<128x8xf32>
    %5 = arith.addf %2, %4 : vector<128x8xf32>
    %cst_5 = arith.constant 0.000000e+00 : f32
    %6 = vector.broadcast %cst_5 : f32 to vector<128x8xf32>
    %7 = arith.maximumf %5, %6 : vector<128x8xf32>
    %c0_6 = arith.constant 0 : index
    %c0_7 = arith.constant 0 : index
    %8 = vector.load %arg4[%c0_6, %c0_7] : memref<128x8xf32, #tpu.memory_space<vmem>>, vector<128x8xf32>
    tpu.vector_store %arg4[%c0_6, %c0_7], %7 {strides = array<i32>} : memref<128x8xf32, #tpu.memory_space<vmem>>, vector<128x8xf32>,
    return
  }
  func.func @transform_0(%arg0: i32) -> (i32, i32) {
    %c0_i32 = arith.constant 0 : i32
    %c0_i32_0 = arith.constant 0 : i32
    return %arg0, %c0_i32 : i32, i32
  }
  func.func @transform_1(%arg0: i32) -> (i32, i32) {
    %c0_i32 = arith.constant 0 : i32
    %c0_i32_0 = arith.constant 0 : i32
    %c0_i32_1 = arith.constant 0 : i32
    return %c0_i32, %c0_i32_0 : i32, i32
  }
  func.func @transform_2(%arg0: i32) -> (i32, i32) {
    %c0_i32 = arith.constant 0 : i32
    %c0_i32_0 = arith.constant 0 : i32
    %c0_i32_1 = arith.constant 0 : i32
    return %c0_i32, %c0_i32_0 : i32, i32
  }
  func.func @transform_3(%arg0: i32) -> (i32, i32) {
    %c0_i32 = arith.constant 0 : i32
    %c0_i32_0 = arith.constant 0 : i32
    return %arg0, %c0_i32 : i32, i32
  }
}

module attributes {stable_mosaic.version = 11 : i64} {
  func.func @_conv_vq_kernel(%arg0: i32, %arg1: memref<32x72xf32, #tpu.memory_space<vmem>>, %arg2: memref<72x8xf32, #tpu.memory_space<vmem>>, %arg3: memref<1x8xf32, #tpu.memory_space<vmem>>, %arg4: memref<8x32xf32, #tpu.memory_space<vmem>>, %arg5: memref<32x128xi32, #tpu.memory_space<vmem>>) attributes {dimension_semantics = [#tpu.dimension_semantics<parallel>], iteration_bounds = array<i64: 1>, scalar_prefetch = 0 : i64, scratch_operands = 0 : i64, tpu.core_type = #tpu.core_type<tc>, window_params = [{transform_indices = @transform_0, window_bounds = array<i64: 32, 72>}, {pipeline_mode = #tpu.pipeline_mode<synchronous>, transform_indices = @transform_1, window_bounds = array<i64: 72, 8>}, {pipeline_mode = #tpu.pipeline_mode<synchronous>, transform_indices = @transform_2, window_bounds = array<i64: 1, 8>}, {pipeline_mode = #tpu.pipeline_mode<synchronous>, transform_indices = @transform_3, window_bounds = array<i64: 8, 32>}, {transform_indices = @transform_4, window_bounds = array<i64: 32, 128>}]} {
    %c0 = arith.constant 0 : index
    %c0_0 = arith.constant 0 : index
    %0 = vector.load %arg1[%c0, %c0_0] : memref<32x72xf32, #tpu.memory_space<vmem>>, vector<32x72xf32>
    %c0_1 = arith.constant 0 : index
    %c0_2 = arith.constant 0 : index
    %1 = vector.load %arg2[%c0_1, %c0_2] : memref<72x8xf32, #tpu.memory_space<vmem>>, vector<72x8xf32>
    %cst = arith.constant dense<0.000000e+00> : vector<32x8xf32>
    %2 = tpu.matmul %0, %1, %cst {dimension_numbers = #tpu.dot_dimension_numbers<[1], [0], [0], [1], [0, 0, 1, 1], [], []>} : vector<32x72xf32>, vector<72x8xf32>, vector<32x8xf32> -> vector<32x8xf32>
    %c0_3 = arith.constant 0 : index
    %c0_4 = arith.constant 0 : index
    %3 = vector.load %arg3[%c0_3, %c0_4] : memref<1x8xf32, #tpu.memory_space<vmem>>, vector<1x8xf32>
    %4 = vector.broadcast %3 : vector<1x8xf32> to vector<32x8xf32>
    %5 = arith.addf %2, %4 : vector<32x8xf32>
    %c0_5 = arith.constant 0 : index
    %c0_6 = arith.constant 0 : index
    %6 = vector.load %arg4[%c0_5, %c0_6] : memref<8x32xf32, #tpu.memory_space<vmem>>, vector<8x32xf32>
    %7 = arith.mulf %6, %6 : vector<8x32xf32>
    %cst_7 = arith.constant dense<0.000000e+00> : vector<32xf32>
    %8 = vector.multi_reduction <add>, %7, %cst_7 [0] : vector<8x32xf32> to vector<32xf32>
    %9 = vector.shape_cast %8 : vector<32xf32> to vector<1x32xf32>
    %cst_8 = arith.constant dense<0.000000e+00> : vector<32x32xf32>
    %10 = tpu.matmul %5, %6, %cst_8 {dimension_numbers = #tpu.dot_dimension_numbers<[1], [0], [0], [1], [0, 0, 1, 1], [], []>} : vector<32x8xf32>, vector<8x32xf32>, vector<32x32xf32> -> vector<32x32xf32>
    %cst_9 = arith.constant 2.000000e+00 : f32
    %11 = vector.broadcast %cst_9 : f32 to vector<32x32xf32>
    %12 = arith.mulf %11, %10 : vector<32x32xf32>
    %13 = vector.broadcast %9 : vector<1x32xf32> to vector<32x32xf32>
    %14 = arith.subf %13, %12 : vector<32x32xf32>
    %cst_10 = arith.constant dense<0x7F800000> : vector<32xf32>
    %15 = vector.multi_reduction <minimumf>, %14, %cst_10 [1] : vector<32x32xf32> to vector<32xf32>
    %16 = vector.shape_cast %15 : vector<32xf32> to vector<32x1xf32>
    %17 = tpu.iota {dimensions = array<i32: 1>} : vector<32x32xi32>
    %18 = vector.broadcast %16 : vector<32x1xf32> to vector<32x32xf32>
    %19 = arith.cmpf ole, %14, %18 : vector<32x32xf32>
    %c1073741824_i32 = arith.constant 1073741824 : i32
    %20 = vector.broadcast %c1073741824_i32 : i32 to vector<32x32xi32>
    %21 = arith.select %19, %17, %20 : vector<32x32xi1>, vector<32x32xi32>
    %cst_11 = arith.constant dense<2147483647> : vector<32xi32>
    %22 = vector.multi_reduction <minsi>, %21, %cst_11 [1] : vector<32x32xi32> to vector<32xi32>
    %23 = vector.shape_cast %22 : vector<32xi32> to vector<32x1xi32>
    %24 = vector.shape_cast %23 : vector<32x1xi32> to vector<32x1xi32>
    %25 = vector.broadcast %24 : vector<32x1xi32> to vector<32x128xi32>
    %c0_12 = arith.constant 0 : index
    %c0_13 = arith.constant 0 : index
    %26 = vector.load %arg5[%c0_12, %c0_13] : memref<32x128xi32, #tpu.memory_space<vmem>>, vector<32x128xi32>
    tpu.vector_store %arg5[%c0_12, %c0_13], %25 {strides = array<i32>} : memref<32x128xi32, #tpu.memory_space<vmem>>, vector<32x128xi32>,
    return
  }
  func.func @transform_0(%arg0: i32) -> (i32, i32) {
    %c0_i32 = arith.constant 0 : i32
    %c0_i32_0 = arith.constant 0 : i32
    return %arg0, %c0_i32 : i32, i32
  }
  func.func @transform_1(%arg0: i32) -> (i32, i32) {
    %c0_i32 = arith.constant 0 : i32
    %c0_i32_0 = arith.constant 0 : i32
    %c0_i32_1 = arith.constant 0 : i32
    return %c0_i32, %c0_i32_0 : i32, i32
  }
  func.func @transform_2(%arg0: i32) -> (i32, i32) {
    %c0_i32 = arith.constant 0 : i32
    %c0_i32_0 = arith.constant 0 : i32
    %c0_i32_1 = arith.constant 0 : i32
    return %c0_i32, %c0_i32_0 : i32, i32
  }
  func.func @transform_3(%arg0: i32) -> (i32, i32) {
    %c0_i32 = arith.constant 0 : i32
    %c0_i32_0 = arith.constant 0 : i32
    %c0_i32_1 = arith.constant 0 : i32
    return %c0_i32, %c0_i32_0 : i32, i32
  }
  func.func @transform_4(%arg0: i32) -> (i32, i32) {
    %c0_i32 = arith.constant 0 : i32
    %c0_i32_0 = arith.constant 0 : i32
    return %arg0, %c0_i32 : i32, i32
  }
}

module attributes {stable_mosaic.version = 11 : i64} {
  func.func @_lm_head_kernel(%arg0: i32, %arg1: i32, %arg2: memref<32x32xf32, #tpu.memory_space<vmem>>, %arg3: memref<32x64xbf16, #tpu.memory_space<vmem>>, %arg4: memref<32x64xf32, #tpu.memory_space<vmem>>) attributes {dimension_semantics = [#tpu.dimension_semantics<parallel>, #tpu.dimension_semantics<parallel>], iteration_bounds = array<i64: 1, 1>, scalar_prefetch = 0 : i64, scratch_operands = 0 : i64, tpu.core_type = #tpu.core_type<tc>, window_params = [{transform_indices = @transform_0, window_bounds = array<i64: 32, 32>}, {transform_indices = @transform_1, window_bounds = array<i64: 32, 64>}, {transform_indices = @transform_2, window_bounds = array<i64: 32, 64>}]} {
    %c0 = arith.constant 0 : index
    %c0_0 = arith.constant 0 : index
    %0 = vector.load %arg2[%c0, %c0_0] : memref<32x32xf32, #tpu.memory_space<vmem>>, vector<32x32xf32>
    %1 = arith.truncf %0 : vector<32x32xf32> to vector<32x32xbf16>
    %c0_1 = arith.constant 0 : index
    %c0_2 = arith.constant 0 : index
    %2 = vector.load %arg3[%c0_1, %c0_2] : memref<32x64xbf16, #tpu.memory_space<vmem>>, vector<32x64xbf16>
    %cst = arith.constant dense<0.000000e+00> : vector<32x64xf32>
    %3 = tpu.matmul %1, %2, %cst {dimension_numbers = #tpu.dot_dimension_numbers<[1], [0], [0], [1], [0, 0, 1, 1], [], []>} : vector<32x32xbf16>, vector<32x64xbf16>, vector<32x64xf32> -> vector<32x64xf32>
    %c0_3 = arith.constant 0 : index
    %c0_4 = arith.constant 0 : index
    %4 = vector.load %arg4[%c0_3, %c0_4] : memref<32x64xf32, #tpu.memory_space<vmem>>, vector<32x64xf32>
    tpu.vector_store %arg4[%c0_3, %c0_4], %3 {strides = array<i32>} : memref<32x64xf32, #tpu.memory_space<vmem>>, vector<32x64xf32>,
    return
  }
  func.func @transform_0(%arg0: i32, %arg1: i32) -> (i32, i32) {
    %c0_i32 = arith.constant 0 : i32
    %c0_i32_0 = arith.constant 0 : i32
    return %arg0, %c0_i32 : i32, i32
  }
  func.func @transform_1(%arg0: i32, %arg1: i32) -> (i32, i32) {
    %c0_i32 = arith.constant 0 : i32
    %c0_i32_0 = arith.constant 0 : i32
    return %c0_i32, %arg1 : i32, i32
  }
  func.func @transform_2(%arg0: i32, %arg1: i32) -> (i32, i32) {
    %c0_i32 = arith.constant 0 : i32
    return %arg0, %arg1 : i32, i32
  }
}

module attributes {stable_mosaic.version = 11 : i64} {
  func.func @_encoder_layer_kernel(%arg0: i32, %arg1: i32, %arg2: memref<1x8x32xf32, #tpu.memory_space<vmem>>, %arg3: memref<1x1x8xf32, #tpu.memory_space<vmem>>, %arg4: memref<1x32xf32, #tpu.memory_space<vmem>>, %arg5: memref<1x32xf32, #tpu.memory_space<vmem>>, %arg6: memref<1x1x32xf32, #tpu.memory_space<vmem>>, %arg7: memref<1x1x32xf32, #tpu.memory_space<vmem>>, %arg8: memref<1x32x96xbf16, #tpu.memory_space<vmem>>, %arg9: memref<1x32x32xbf16, #tpu.memory_space<vmem>>, %arg10: memref<1x1x32xf32, #tpu.memory_space<vmem>>, %arg11: memref<1x1x32xf32, #tpu.memory_space<vmem>>, %arg12: memref<1x1x32xf32, #tpu.memory_space<vmem>>, %arg13: memref<1x1x32xf32, #tpu.memory_space<vmem>>, %arg14: memref<1x32x64xbf16, #tpu.memory_space<vmem>>, %arg15: memref<1x32x64xbf16, #tpu.memory_space<vmem>>, %arg16: memref<1x1x64xf32, #tpu.memory_space<vmem>>, %arg17: memref<1x1x64xf32, #tpu.memory_space<vmem>>, %arg18: memref<1x64x32xbf16, #tpu.memory_space<vmem>>, %arg19: memref<1x32xf32, #tpu.memory_space<vmem>>, %arg20: memref<1x32xf32, #tpu.memory_space<vmem>>, %arg21: memref<1x8x32xf32, #tpu.memory_space<vmem>>, %arg22: memref<8x32xf32, #tpu.memory_space<vmem>>, %arg23: memref<8x32xf32, #tpu.memory_space<vmem>>) attributes {dimension_semantics = [#tpu.dimension_semantics<parallel>, #tpu.dimension_semantics<arbitrary>], iteration_bounds = array<i64: 2, 2>, scalar_prefetch = 0 : i64, scratch_operands = 2 : i64, tpu.core_type = #tpu.core_type<tc>, window_params = [{transform_indices = @transform_0, window_bounds = array<i64: 1, 8, 32>}, {transform_indices = @transform_1, window_bounds = array<i64: 1, 1, 8>}, {pipeline_mode = #tpu.pipeline_mode<synchronous>, transform_indices = @transform_2, window_bounds = array<i64: 1, 32>}, {pipeline_mode = #tpu.pipeline_mode<synchronous>, transform_indices = @transform_3, window_bounds = array<i64: 1, 32>}, {transform_indices = @transform_4, window_bounds = array<i64: 1, 1, 32>}, {transform_indices = @transform_5, window_bounds = array<i64: 1, 1, 32>}, {transform_indices = @transform_6, window_bounds = array<i64: 1, 32, 96>}, {transform_indices = @transform_7, window_bounds = array<i64: 1, 32, 32>}, {transform_indices = @transform_8, window_bounds = array<i64: 1, 1, 32>}, {transform_indices = @transform_9, window_bounds = array<i64: 1, 1, 32>}, {transform_indices = @transform_10, window_bounds = array<i64: 1, 1, 32>}, {transform_indices = @transform_11, window_bounds = array<i64: 1, 1, 32>}, {transform_indices = @transform_12, window_bounds = array<i64: 1, 32, 64>}, {transform_indices = @transform_13, window_bounds = array<i64: 1, 32, 64>}, {transform_indices = @transform_14, window_bounds = array<i64: 1, 1, 64>}, {transform_indices = @transform_15, window_bounds = array<i64: 1, 1, 64>}, {transform_indices = @transform_16, window_bounds = array<i64: 1, 64, 32>}, {pipeline_mode = #tpu.pipeline_mode<synchronous>, transform_indices = @transform_17, window_bounds = array<i64: 1, 32>}, {pipeline_mode = #tpu.pipeline_mode<synchronous>, transform_indices = @transform_18, window_bounds = array<i64: 1, 32>}, {transform_indices = @transform_19, window_bounds = array<i64: 1, 8, 32>}]} {
    %c0_i32 = arith.constant 0 : i32
    %0 = arith.cmpi eq, %arg1, %c0_i32 : i32
    %1 = arith.extui %0 : i1 to i32
    %c0_i32_0 = arith.constant 0 : i32
    %2 = arith.cmpi ne, %1, %c0_i32_0 : i32
    scf.if %2 {
      %c0_97 = arith.constant 0 : index
      %c0_98 = arith.constant 0 : index
      %c0_99 = arith.constant 0 : index
      %220 = vector.load %arg2[%c0_97, %c0_98, %c0_99] : memref<1x8x32xf32, #tpu.memory_space<vmem>>, vector<1x8x32xf32>
      %221 = vector.shape_cast %220 : vector<1x8x32xf32> to vector<8x32xf32>
      %c0_100 = arith.constant 0 : index
      %c0_101 = arith.constant 0 : index
      %222 = vector.load %arg4[%c0_100, %c0_101] : memref<1x32xf32, #tpu.memory_space<vmem>>, vector<1x32xf32>
      %c0_102 = arith.constant 0 : index
      %c0_103 = arith.constant 0 : index
      %223 = vector.load %arg5[%c0_102, %c0_103] : memref<1x32xf32, #tpu.memory_space<vmem>>, vector<1x32xf32>
      %cst_104 = arith.constant dense<0.000000e+00> : vector<8xf32>
      %224 = vector.multi_reduction <add>, %221, %cst_104 [1] : vector<8x32xf32> to vector<8xf32>
      %225 = vector.shape_cast %224 : vector<8xf32> to vector<8x1xf32>
      %cst_105 = arith.constant 3.200000e+01 : f32
      %226 = vector.broadcast %cst_105 : f32 to vector<8x1xf32>
      %227 = arith.divf %225, %226 : vector<8x1xf32>
      %228 = vector.broadcast %227 : vector<8x1xf32> to vector<8x32xf32>
      %229 = arith.subf %221, %228 : vector<8x32xf32>
      %230 = arith.mulf %229, %229 : vector<8x32xf32>
      %cst_106 = arith.constant dense<0.000000e+00> : vector<8xf32>
      %231 = vector.multi_reduction <add>, %230, %cst_106 [1] : vector<8x32xf32> to vector<8xf32>
      %232 = vector.shape_cast %231 : vector<8xf32> to vector<8x1xf32>
      %cst_107 = arith.constant 3.200000e+01 : f32
      %233 = vector.broadcast %cst_107 : f32 to vector<8x1xf32>
      %234 = arith.divf %232, %233 : vector<8x1xf32>
      %235 = vector.broadcast %227 : vector<8x1xf32> to vector<8x32xf32>
      %236 = arith.subf %221, %235 : vector<8x32xf32>
      %cst_108 = arith.constant 9.99999974E-6 : f32
      %237 = vector.broadcast %cst_108 : f32 to vector<8x1xf32>
      %238 = arith.addf %234, %237 : vector<8x1xf32>
      %239 = math.rsqrt %238 : vector<8x1xf32>
      %240 = vector.broadcast %239 : vector<8x1xf32> to vector<8x32xf32>
      %241 = arith.mulf %236, %240 : vector<8x32xf32>
      %242 = vector.broadcast %222 : vector<1x32xf32> to vector<8x32xf32>
      %243 = arith.mulf %241, %242 : vector<8x32xf32>
      %244 = vector.broadcast %223 : vector<1x32xf32> to vector<8x32xf32>
      %245 = arith.addf %243, %244 : vector<8x32xf32>
      %c0_109 = arith.constant 0 : index
      %c0_110 = arith.constant 0 : index
      %246 = vector.load %arg22[%c0_109, %c0_110] : memref<8x32xf32, #tpu.memory_space<vmem>>, vector<8x32xf32>
      tpu.vector_store %arg22[%c0_109, %c0_110], %245 {strides = array<i32>} : memref<8x32xf32, #tpu.memory_space<vmem>>, vector<8x32xf32>,
    } else {
    }
    %c0 = arith.constant 0 : index
    %c0_1 = arith.constant 0 : index
    %c0_2 = arith.constant 0 : index
    %3 = vector.load %arg3[%c0, %c0_1, %c0_2] : memref<1x1x8xf32, #tpu.memory_space<vmem>>, vector<1x1x8xf32>
    %4 = vector.shape_cast %3 : vector<1x1x8xf32> to vector<1x8xf32>
    %c0_3 = arith.constant 0 : index
    %c0_4 = arith.constant 0 : index
    %5 = vector.load %arg22[%c0_3, %c0_4] : memref<8x32xf32, #tpu.memory_space<vmem>>, vector<8x32xf32>
    %c0_5 = arith.constant 0 : index
    %c0_6 = arith.constant 0 : index
    %c0_7 = arith.constant 0 : index
    %6 = vector.load %arg6[%c0_5, %c0_6, %c0_7] : memref<1x1x32xf32, #tpu.memory_space<vmem>>, vector<1x1x32xf32>
    %7 = vector.shape_cast %6 : vector<1x1x32xf32> to vector<1x32xf32>
    %c0_8 = arith.constant 0 : index
    %c0_9 = arith.constant 0 : index
    %c0_10 = arith.constant 0 : index
    %8 = vector.load %arg7[%c0_8, %c0_9, %c0_10] : memref<1x1x32xf32, #tpu.memory_space<vmem>>, vector<1x1x32xf32>
    %9 = vector.shape_cast %8 : vector<1x1x32xf32> to vector<1x32xf32>
    %cst = arith.constant dense<0.000000e+00> : vector<8xf32>
    %10 = vector.multi_reduction <add>, %5, %cst [1] : vector<8x32xf32> to vector<8xf32>
    %11 = vector.shape_cast %10 : vector<8xf32> to vector<8x1xf32>
    %cst_11 = arith.constant 3.200000e+01 : f32
    %12 = vector.broadcast %cst_11 : f32 to vector<8x1xf32>
    %13 = arith.divf %11, %12 : vector<8x1xf32>
    %14 = vector.broadcast %13 : vector<8x1xf32> to vector<8x32xf32>
    %15 = arith.subf %5, %14 : vector<8x32xf32>
    %16 = arith.mulf %15, %15 : vector<8x32xf32>
    %cst_12 = arith.constant dense<0.000000e+00> : vector<8xf32>
    %17 = vector.multi_reduction <add>, %16, %cst_12 [1] : vector<8x32xf32> to vector<8xf32>
    %18 = vector.shape_cast %17 : vector<8xf32> to vector<8x1xf32>
    %cst_13 = arith.constant 3.200000e+01 : f32
    %19 = vector.broadcast %cst_13 : f32 to vector<8x1xf32>
    %20 = arith.divf %18, %19 : vector<8x1xf32>
    %21 = vector.broadcast %13 : vector<8x1xf32> to vector<8x32xf32>
    %22 = arith.subf %5, %21 : vector<8x32xf32>
    %cst_14 = arith.constant 9.99999974E-6 : f32
    %23 = vector.broadcast %cst_14 : f32 to vector<8x1xf32>
    %24 = arith.addf %20, %23 : vector<8x1xf32>
    %25 = math.rsqrt %24 : vector<8x1xf32>
    %26 = vector.broadcast %25 : vector<8x1xf32> to vector<8x32xf32>
    %27 = arith.mulf %22, %26 : vector<8x32xf32>
    %28 = vector.broadcast %7 : vector<1x32xf32> to vector<8x32xf32>
    %29 = arith.mulf %27, %28 : vector<8x32xf32>
    %30 = vector.broadcast %9 : vector<1x32xf32> to vector<8x32xf32>
    %31 = arith.addf %29, %30 : vector<8x32xf32>
    %c0_15 = arith.constant 0 : index
    %c0_16 = arith.constant 0 : index
    %c0_17 = arith.constant 0 : index
    %32 = vector.load %arg8[%c0_15, %c0_16, %c0_17] : memref<1x32x96xbf16, #tpu.memory_space<vmem>>, vector<1x32x96xbf16>
    %33 = vector.shape_cast %32 : vector<1x32x96xbf16> to vector<32x96xbf16>
    %c0_18 = arith.constant 0 : index
    %c0_19 = arith.constant 0 : index
    %c0_20 = arith.constant 0 : index
    %34 = vector.load %arg9[%c0_18, %c0_19, %c0_20] : memref<1x32x32xbf16, #tpu.memory_space<vmem>>, vector<1x32x32xbf16>
    %35 = vector.shape_cast %34 : vector<1x32x32xbf16> to vector<32x32xbf16>
    %36 = arith.truncf %31 : vector<8x32xf32> to vector<8x32xbf16>
    %cst_21 = arith.constant dense<0.000000e+00> : vector<8x96xf32>
    %37 = tpu.matmul %36, %33, %cst_21 {dimension_numbers = #tpu.dot_dimension_numbers<[1], [0], [0], [1], [0, 0, 1, 1], [], []>} : vector<8x32xbf16>, vector<32x96xbf16>, vector<8x96xf32> -> vector<8x96xf32>
    %38 = vector.extract_strided_slice %37 {offsets = [0, 0], sizes = [8, 32], strides = [1, 1]} : vector<8x96xf32> to vector<8x32xf32>
    %39 = vector.extract_strided_slice %37 {offsets = [0, 32], sizes = [8, 32], strides = [1, 1]} : vector<8x96xf32> to vector<8x32xf32>
    %40 = vector.extract_strided_slice %37 {offsets = [0, 64], sizes = [8, 32], strides = [1, 1]} : vector<8x96xf32> to vector<8x32xf32>
    %41 = vector.extract_strided_slice %38 {offsets = [0, 0], sizes = [8, 8], strides = [1, 1]} : vector<8x32xf32> to vector<8x8xf32>
    %42 = vector.extract_strided_slice %39 {offsets = [0, 0], sizes = [8, 8], strides = [1, 1]} : vector<8x32xf32> to vector<8x8xf32>
    "tpu.trace_start"() <{level = 10 : i32, message = "qc,kc->qk"}> : () -> ()
    %cst_22 = arith.constant dense<0.000000e+00> : vector<8x8xf32>
    %43 = tpu.matmul %41, %42, %cst_22 {dimension_numbers = #tpu.dot_dimension_numbers<[1], [1], [0], [0], [0, 0, 1, 0], [], []>} : vector<8x8xf32>, vector<8x8xf32>, vector<8x8xf32> -> vector<8x8xf32>
    "tpu.trace_stop"() : () -> ()
    %44 = vector.broadcast %4 : vector<1x8xf32> to vector<8x8xf32>
    %45 = arith.addf %43, %44 : vector<8x8xf32>
    %cst_23 = arith.constant dense<0xFF800000> : vector<8xf32>
    %46 = vector.multi_reduction <maximumf>, %45, %cst_23 [1] : vector<8x8xf32> to vector<8xf32>
    %47 = vector.shape_cast %46 : vector<8xf32> to vector<8x1xf32>
    %48 = vector.broadcast %47 : vector<8x1xf32> to vector<8x8xf32>
    %49 = arith.subf %45, %48 : vector<8x8xf32>
    %50 = math.exp %49 : vector<8x8xf32>
    %cst_24 = arith.constant dense<0.000000e+00> : vector<8xf32>
    %51 = vector.multi_reduction <add>, %50, %cst_24 [1] : vector<8x8xf32> to vector<8xf32>
    %52 = vector.shape_cast %51 : vector<8xf32> to vector<8x1xf32>
    %53 = tpu.reciprocal %52 {approx = true} : vector<8x1xf32> -> vector<8x1xf32>
    %54 = vector.broadcast %53 : vector<8x1xf32> to vector<8x8xf32>
    %55 = arith.mulf %50, %54 : vector<8x8xf32>
    %56 = vector.extract_strided_slice %40 {offsets = [0, 0], sizes = [8, 8], strides = [1, 1]} : vector<8x32xf32> to vector<8x8xf32>
    %cst_25 = arith.constant dense<0.000000e+00> : vector<8x8xf32>
    %57 = tpu.matmul %55, %56, %cst_25 {dimension_numbers = #tpu.dot_dimension_numbers<[1], [0], [0], [1], [0, 0, 1, 1], [], []>} : vector<8x8xf32>, vector<8x8xf32>, vector<8x8xf32> -> vector<8x8xf32>
    %c0_26 = arith.constant 0 : index
    %c0_27 = arith.constant 0 : index
    %58 = vector.load %arg23[%c0_26, %c0_27] : memref<8x32xf32, #tpu.memory_space<vmem>>, vector<8x8xf32>
    tpu.vector_store %arg23[%c0_26, %c0_27], %57 {strides = array<i32>} : memref<8x32xf32, #tpu.memory_space<vmem>>, vector<8x8xf32>,
    %59 = vector.extract_strided_slice %38 {offsets = [0, 8], sizes = [8, 8], strides = [1, 1]} : vector<8x32xf32> to vector<8x8xf32>
    %60 = vector.extract_strided_slice %39 {offsets = [0, 8], sizes = [8, 8], strides = [1, 1]} : vector<8x32xf32> to vector<8x8xf32>
    "tpu.trace_start"() <{level = 10 : i32, message = "qc,kc->qk"}> : () -> ()
    %cst_28 = arith.constant dense<0.000000e+00> : vector<8x8xf32>
    %61 = tpu.matmul %59, %60, %cst_28 {dimension_numbers = #tpu.dot_dimension_numbers<[1], [1], [0], [0], [0, 0, 1, 0], [], []>} : vector<8x8xf32>, vector<8x8xf32>, vector<8x8xf32> -> vector<8x8xf32>
    "tpu.trace_stop"() : () -> ()
    %62 = vector.broadcast %4 : vector<1x8xf32> to vector<8x8xf32>
    %63 = arith.addf %61, %62 : vector<8x8xf32>
    %cst_29 = arith.constant dense<0xFF800000> : vector<8xf32>
    %64 = vector.multi_reduction <maximumf>, %63, %cst_29 [1] : vector<8x8xf32> to vector<8xf32>
    %65 = vector.shape_cast %64 : vector<8xf32> to vector<8x1xf32>
    %66 = vector.broadcast %65 : vector<8x1xf32> to vector<8x8xf32>
    %67 = arith.subf %63, %66 : vector<8x8xf32>
    %68 = math.exp %67 : vector<8x8xf32>
    %cst_30 = arith.constant dense<0.000000e+00> : vector<8xf32>
    %69 = vector.multi_reduction <add>, %68, %cst_30 [1] : vector<8x8xf32> to vector<8xf32>
    %70 = vector.shape_cast %69 : vector<8xf32> to vector<8x1xf32>
    %71 = tpu.reciprocal %70 {approx = true} : vector<8x1xf32> -> vector<8x1xf32>
    %72 = vector.broadcast %71 : vector<8x1xf32> to vector<8x8xf32>
    %73 = arith.mulf %68, %72 : vector<8x8xf32>
    %74 = vector.extract_strided_slice %40 {offsets = [0, 8], sizes = [8, 8], strides = [1, 1]} : vector<8x32xf32> to vector<8x8xf32>
    %cst_31 = arith.constant dense<0.000000e+00> : vector<8x8xf32>
    %75 = tpu.matmul %73, %74, %cst_31 {dimension_numbers = #tpu.dot_dimension_numbers<[1], [0], [0], [1], [0, 0, 1, 1], [], []>} : vector<8x8xf32>, vector<8x8xf32>, vector<8x8xf32> -> vector<8x8xf32>
    %c0_32 = arith.constant 0 : index
    %c8 = arith.constant 8 : index
    %76 = vector.load %arg23[%c0_32, %c8] : memref<8x32xf32, #tpu.memory_space<vmem>>, vector<8x8xf32>
    tpu.vector_store %arg23[%c0_32, %c8], %75 {strides = array<i32>} : memref<8x32xf32, #tpu.memory_space<vmem>>, vector<8x8xf32>,
    %77 = vector.extract_strided_slice %38 {offsets = [0, 16], sizes = [8, 8], strides = [1, 1]} : vector<8x32xf32> to vector<8x8xf32>
    %78 = vector.extract_strided_slice %39 {offsets = [0, 16], sizes = [8, 8], strides = [1, 1]} : vector<8x32xf32> to vector<8x8xf32>
    "tpu.trace_start"() <{level = 10 : i32, message = "qc,kc->qk"}> : () -> ()
    %cst_33 = arith.constant dense<0.000000e+00> : vector<8x8xf32>
    %79 = tpu.matmul %77, %78, %cst_33 {dimension_numbers = #tpu.dot_dimension_numbers<[1], [1], [0], [0], [0, 0, 1, 0], [], []>} : vector<8x8xf32>, vector<8x8xf32>, vector<8x8xf32> -> vector<8x8xf32>
    "tpu.trace_stop"() : () -> ()
    %80 = vector.broadcast %4 : vector<1x8xf32> to vector<8x8xf32>
    %81 = arith.addf %79, %80 : vector<8x8xf32>
    %cst_34 = arith.constant dense<0xFF800000> : vector<8xf32>
    %82 = vector.multi_reduction <maximumf>, %81, %cst_34 [1] : vector<8x8xf32> to vector<8xf32>
    %83 = vector.shape_cast %82 : vector<8xf32> to vector<8x1xf32>
    %84 = vector.broadcast %83 : vector<8x1xf32> to vector<8x8xf32>
    %85 = arith.subf %81, %84 : vector<8x8xf32>
    %86 = math.exp %85 : vector<8x8xf32>
    %cst_35 = arith.constant dense<0.000000e+00> : vector<8xf32>
    %87 = vector.multi_reduction <add>, %86, %cst_35 [1] : vector<8x8xf32> to vector<8xf32>
    %88 = vector.shape_cast %87 : vector<8xf32> to vector<8x1xf32>
    %89 = tpu.reciprocal %88 {approx = true} : vector<8x1xf32> -> vector<8x1xf32>
    %90 = vector.broadcast %89 : vector<8x1xf32> to vector<8x8xf32>
    %91 = arith.mulf %86, %90 : vector<8x8xf32>
    %92 = vector.extract_strided_slice %40 {offsets = [0, 16], sizes = [8, 8], strides = [1, 1]} : vector<8x32xf32> to vector<8x8xf32>
    %cst_36 = arith.constant dense<0.000000e+00> : vector<8x8xf32>
    %93 = tpu.matmul %91, %92, %cst_36 {dimension_numbers = #tpu.dot_dimension_numbers<[1], [0], [0], [1], [0, 0, 1, 1], [], []>} : vector<8x8xf32>, vector<8x8xf32>, vector<8x8xf32> -> vector<8x8xf32>
    %c0_37 = arith.constant 0 : index
    %c16 = arith.constant 16 : index
    %94 = vector.load %arg23[%c0_37, %c16] : memref<8x32xf32, #tpu.memory_space<vmem>>, vector<8x8xf32>
    tpu.vector_store %arg23[%c0_37, %c16], %93 {strides = array<i32>} : memref<8x32xf32, #tpu.memory_space<vmem>>, vector<8x8xf32>,
    %95 = vector.extract_strided_slice %38 {offsets = [0, 24], sizes = [8, 8], strides = [1, 1]} : vector<8x32xf32> to vector<8x8xf32>
    %96 = vector.extract_strided_slice %39 {offsets = [0, 24], sizes = [8, 8], strides = [1, 1]} : vector<8x32xf32> to vector<8x8xf32>
    "tpu.trace_start"() <{level = 10 : i32, message = "qc,kc->qk"}> : () -> ()
    %cst_38 = arith.constant dense<0.000000e+00> : vector<8x8xf32>
    %97 = tpu.matmul %95, %96, %cst_38 {dimension_numbers = #tpu.dot_dimension_numbers<[1], [1], [0], [0], [0, 0, 1, 0], [], []>} : vector<8x8xf32>, vector<8x8xf32>, vector<8x8xf32> -> vector<8x8xf32>
    "tpu.trace_stop"() : () -> ()
    %98 = vector.broadcast %4 : vector<1x8xf32> to vector<8x8xf32>
    %99 = arith.addf %97, %98 : vector<8x8xf32>
    %cst_39 = arith.constant dense<0xFF800000> : vector<8xf32>
    %100 = vector.multi_reduction <maximumf>, %99, %cst_39 [1] : vector<8x8xf32> to vector<8xf32>
    %101 = vector.shape_cast %100 : vector<8xf32> to vector<8x1xf32>
    %102 = vector.broadcast %101 : vector<8x1xf32> to vector<8x8xf32>
    %103 = arith.subf %99, %102 : vector<8x8xf32>
    %104 = math.exp %103 : vector<8x8xf32>
    %cst_40 = arith.constant dense<0.000000e+00> : vector<8xf32>
    %105 = vector.multi_reduction <add>, %104, %cst_40 [1] : vector<8x8xf32> to vector<8xf32>
    %106 = vector.shape_cast %105 : vector<8xf32> to vector<8x1xf32>
    %107 = tpu.reciprocal %106 {approx = true} : vector<8x1xf32> -> vector<8x1xf32>
    %108 = vector.broadcast %107 : vector<8x1xf32> to vector<8x8xf32>
    %109 = arith.mulf %104, %108 : vector<8x8xf32>
    %110 = vector.extract_strided_slice %40 {offsets = [0, 24], sizes = [8, 8], strides = [1, 1]} : vector<8x32xf32> to vector<8x8xf32>
    %cst_41 = arith.constant dense<0.000000e+00> : vector<8x8xf32>
    %111 = tpu.matmul %109, %110, %cst_41 {dimension_numbers = #tpu.dot_dimension_numbers<[1], [0], [0], [1], [0, 0, 1, 1], [], []>} : vector<8x8xf32>, vector<8x8xf32>, vector<8x8xf32> -> vector<8x8xf32>
    %c0_42 = arith.constant 0 : index
    %c24 = arith.constant 24 : index
    %112 = vector.load %arg23[%c0_42, %c24] : memref<8x32xf32, #tpu.memory_space<vmem>>, vector<8x8xf32>
    tpu.vector_store %arg23[%c0_42, %c24], %111 {strides = array<i32>} : memref<8x32xf32, #tpu.memory_space<vmem>>, vector<8x8xf32>,
    %c0_43 = arith.constant 0 : index
    %c0_44 = arith.constant 0 : index
    %113 = vector.load %arg23[%c0_43, %c0_44] : memref<8x32xf32, #tpu.memory_space<vmem>>, vector<8x32xf32>
    %114 = arith.truncf %113 : vector<8x32xf32> to vector<8x32xbf16>
    %cst_45 = arith.constant dense<0.000000e+00> : vector<8x32xf32>
    %115 = tpu.matmul %114, %35, %cst_45 {dimension_numbers = #tpu.dot_dimension_numbers<[1], [0], [0], [1], [0, 0, 1, 1], [], []>} : vector<8x32xbf16>, vector<32x32xbf16>, vector<8x32xf32> -> vector<8x32xf32>
    %c0_46 = arith.constant 0 : index
    %c0_47 = arith.constant 0 : index
    %c0_48 = arith.constant 0 : index
    %116 = vector.load %arg10[%c0_46, %c0_47, %c0_48] : memref<1x1x32xf32, #tpu.memory_space<vmem>>, vector<1x1x32xf32>
    %117 = vector.shape_cast %116 : vector<1x1x32xf32> to vector<1x32xf32>
    %c0_49 = arith.constant 0 : index
    %c0_50 = arith.constant 0 : index
    %c0_51 = arith.constant 0 : index
    %118 = vector.load %arg11[%c0_49, %c0_50, %c0_51] : memref<1x1x32xf32, #tpu.memory_space<vmem>>, vector<1x1x32xf32>
    %119 = vector.shape_cast %118 : vector<1x1x32xf32> to vector<1x32xf32>
    %cst_52 = arith.constant dense<0.000000e+00> : vector<8xf32>
    %120 = vector.multi_reduction <add>, %115, %cst_52 [1] : vector<8x32xf32> to vector<8xf32>
    %121 = vector.shape_cast %120 : vector<8xf32> to vector<8x1xf32>
    %cst_53 = arith.constant 3.200000e+01 : f32
    %122 = vector.broadcast %cst_53 : f32 to vector<8x1xf32>
    %123 = arith.divf %121, %122 : vector<8x1xf32>
    %124 = vector.broadcast %123 : vector<8x1xf32> to vector<8x32xf32>
    %125 = arith.subf %115, %124 : vector<8x32xf32>
    %126 = arith.mulf %125, %125 : vector<8x32xf32>
    %cst_54 = arith.constant dense<0.000000e+00> : vector<8xf32>
    %127 = vector.multi_reduction <add>, %126, %cst_54 [1] : vector<8x32xf32> to vector<8xf32>
    %128 = vector.shape_cast %127 : vector<8xf32> to vector<8x1xf32>
    %cst_55 = arith.constant 3.200000e+01 : f32
    %129 = vector.broadcast %cst_55 : f32 to vector<8x1xf32>
    %130 = arith.divf %128, %129 : vector<8x1xf32>
    %131 = vector.broadcast %123 : vector<8x1xf32> to vector<8x32xf32>
    %132 = arith.subf %115, %131 : vector<8x32xf32>
    %cst_56 = arith.constant 9.99999974E-6 : f32
    %133 = vector.broadcast %cst_56 : f32 to vector<8x1xf32>
    %134 = arith.addf %130, %133 : vector<8x1xf32>
    %135 = math.rsqrt %134 : vector<8x1xf32>
    %136 = vector.broadcast %135 : vector<8x1xf32> to vector<8x32xf32>
    %137 = arith.mulf %132, %136 : vector<8x32xf32>
    %138 = vector.broadcast %117 : vector<1x32xf32> to vector<8x32xf32>
    %139 = arith.mulf %137, %138 : vector<8x32xf32>
    %140 = vector.broadcast %119 : vector<1x32xf32> to vector<8x32xf32>
    %141 = arith.addf %139, %140 : vector<8x32xf32>
    %142 = arith.addf %5, %141 : vector<8x32xf32>
    %c0_57 = arith.constant 0 : index
    %c0_58 = arith.constant 0 : index
    %c0_59 = arith.constant 0 : index
    %143 = vector.load %arg12[%c0_57, %c0_58, %c0_59] : memref<1x1x32xf32, #tpu.memory_space<vmem>>, vector<1x1x32xf32>
    %144 = vector.shape_cast %143 : vector<1x1x32xf32> to vector<1x32xf32>
    %c0_60 = arith.constant 0 : index
    %c0_61 = arith.constant 0 : index
    %c0_62 = arith.constant 0 : index
    %145 = vector.load %arg13[%c0_60, %c0_61, %c0_62] : memref<1x1x32xf32, #tpu.memory_space<vmem>>, vector<1x1x32xf32>
    %146 = vector.shape_cast %145 : vector<1x1x32xf32> to vector<1x32xf32>
    %c0_63 = arith.constant 0 : index
    %c0_64 = arith.constant 0 : index
    %c0_65 = arith.constant 0 : index
    %147 = vector.load %arg14[%c0_63, %c0_64, %c0_65] : memref<1x32x64xbf16, #tpu.memory_space<vmem>>, vector<1x32x64xbf16>
    %148 = vector.shape_cast %147 : vector<1x32x64xbf16> to vector<32x64xbf16>
    %c0_66 = arith.constant 0 : index
    %c0_67 = arith.constant 0 : index
    %c0_68 = arith.constant 0 : index
    %149 = vector.load %arg15[%c0_66, %c0_67, %c0_68] : memref<1x32x64xbf16, #tpu.memory_space<vmem>>, vector<1x32x64xbf16>
    %150 = vector.shape_cast %149 : vector<1x32x64xbf16> to vector<32x64xbf16>
    %c0_69 = arith.constant 0 : index
    %c0_70 = arith.constant 0 : index
    %c0_71 = arith.constant 0 : index
    %151 = vector.load %arg16[%c0_69, %c0_70, %c0_71] : memref<1x1x64xf32, #tpu.memory_space<vmem>>, vector<1x1x64xf32>
    %152 = vector.shape_cast %151 : vector<1x1x64xf32> to vector<1x64xf32>
    %c0_72 = arith.constant 0 : index
    %c0_73 = arith.constant 0 : index
    %c0_74 = arith.constant 0 : index
    %153 = vector.load %arg17[%c0_72, %c0_73, %c0_74] : memref<1x1x64xf32, #tpu.memory_space<vmem>>, vector<1x1x64xf32>
    %154 = vector.shape_cast %153 : vector<1x1x64xf32> to vector<1x64xf32>
    %c0_75 = arith.constant 0 : index
    %c0_76 = arith.constant 0 : index
    %c0_77 = arith.constant 0 : index
    %155 = vector.load %arg18[%c0_75, %c0_76, %c0_77] : memref<1x64x32xbf16, #tpu.memory_space<vmem>>, vector<1x64x32xbf16>
    %156 = vector.shape_cast %155 : vector<1x64x32xbf16> to vector<64x32xbf16>
    %cst_78 = arith.constant dense<0.000000e+00> : vector<8xf32>
    %157 = vector.multi_reduction <add>, %142, %cst_78 [1] : vector<8x32xf32> to vector<8xf32>
    %158 = vector.shape_cast %157 : vector<8xf32> to vector<8x1xf32>
    %cst_79 = arith.constant 3.200000e+01 : f32
    %159 = vector.broadcast %cst_79 : f32 to vector<8x1xf32>
    %160 = arith.divf %158, %159 : vector<8x1xf32>
    %161 = vector.broadcast %160 : vector<8x1xf32> to vector<8x32xf32>
    %162 = arith.subf %142, %161 : vector<8x32xf32>
    %163 = arith.mulf %162, %162 : vector<8x32xf32>
    %cst_80 = arith.constant dense<0.000000e+00> : vector<8xf32>
    %164 = vector.multi_reduction <add>, %163, %cst_80 [1] : vector<8x32xf32> to vector<8xf32>
    %165 = vector.shape_cast %164 : vector<8xf32> to vector<8x1xf32>
    %cst_81 = arith.constant 3.200000e+01 : f32
    %166 = vector.broadcast %cst_81 : f32 to vector<8x1xf32>
    %167 = arith.divf %165, %166 : vector<8x1xf32>
    %168 = vector.broadcast %160 : vector<8x1xf32> to vector<8x32xf32>
    %169 = arith.subf %142, %168 : vector<8x32xf32>
    %cst_82 = arith.constant 9.99999974E-6 : f32
    %170 = vector.broadcast %cst_82 : f32 to vector<8x1xf32>
    %171 = arith.addf %167, %170 : vector<8x1xf32>
    %172 = math.rsqrt %171 : vector<8x1xf32>
    %173 = vector.broadcast %172 : vector<8x1xf32> to vector<8x32xf32>
    %174 = arith.mulf %169, %173 : vector<8x32xf32>
    %175 = vector.broadcast %144 : vector<1x32xf32> to vector<8x32xf32>
    %176 = arith.mulf %174, %175 : vector<8x32xf32>
    %177 = vector.broadcast %146 : vector<1x32xf32> to vector<8x32xf32>
    %178 = arith.addf %176, %177 : vector<8x32xf32>
    %179 = arith.truncf %178 : vector<8x32xf32> to vector<8x32xbf16>
    %cst_83 = arith.constant dense<0.000000e+00> : vector<8x64xf32>
    %180 = tpu.matmul %179, %148, %cst_83 {dimension_numbers = #tpu.dot_dimension_numbers<[1], [0], [0], [1], [0, 0, 1, 1], [], []>} : vector<8x32xbf16>, vector<32x64xbf16>, vector<8x64xf32> -> vector<8x64xf32>
    %cst_84 = arith.constant dense<0.000000e+00> : vector<8x64xf32>
    %181 = tpu.matmul %179, %150, %cst_84 {dimension_numbers = #tpu.dot_dimension_numbers<[1], [0], [0], [1], [0, 0, 1, 1], [], []>} : vector<8x32xbf16>, vector<32x64xbf16>, vector<8x64xf32> -> vector<8x64xf32>
    %cst_85 = arith.constant 5.000000e-01 : f32
    %182 = vector.broadcast %cst_85 : f32 to vector<8x64xf32>
    %183 = arith.mulf %182, %180 : vector<8x64xf32>
    %cst_86 = arith.constant 0.707106769 : f32
    %184 = vector.broadcast %cst_86 : f32 to vector<8x64xf32>
    %185 = arith.mulf %180, %184 : vector<8x64xf32>
    %186 = math.erf %185 : vector<8x64xf32>
    %cst_87 = arith.constant 1.000000e+00 : f32
    %187 = vector.broadcast %cst_87 : f32 to vector<8x64xf32>
    %188 = arith.addf %187, %186 : vector<8x64xf32>
    %189 = arith.mulf %183, %188 : vector<8x64xf32>
    %190 = arith.mulf %189, %181 : vector<8x64xf32>
    %cst_88 = arith.constant dense<0.000000e+00> : vector<8xf32>
    %191 = vector.multi_reduction <add>, %190, %cst_88 [1] : vector<8x64xf32> to vector<8xf32>
    %192 = vector.shape_cast %191 : vector<8xf32> to vector<8x1xf32>
    %cst_89 = arith.constant 6.400000e+01 : f32
    %193 = vector.broadcast %cst_89 : f32 to vector<8x1xf32>
    %194 = arith.divf %192, %193 : vector<8x1xf32>
    %195 = vector.broadcast %194 : vector<8x1xf32> to vector<8x64xf32>
    %196 = arith.subf %190, %195 : vector<8x64xf32>
    %197 = arith.mulf %196, %196 : vector<8x64xf32>
    %cst_90 = arith.constant dense<0.000000e+00> : vector<8xf32>
    %198 = vector.multi_reduction <add>, %197, %cst_90 [1] : vector<8x64xf32> to vector<8xf32>
    %199 = vector.shape_cast %198 : vector<8xf32> to vector<8x1xf32>
    %cst_91 = arith.constant 6.400000e+01 : f32
    %200 = vector.broadcast %cst_91 : f32 to vector<8x1xf32>
    %201 = arith.divf %199, %200 : vector<8x1xf32>
    %202 = vector.broadcast %194 : vector<8x1xf32> to vector<8x64xf32>
    %203 = arith.subf %190, %202 : vector<8x64xf32>
    %cst_92 = arith.constant 9.99999974E-6 : f32
    %204 = vector.broadcast %cst_92 : f32 to vector<8x1xf32>
    %205 = arith.addf %201, %204 : vector<8x1xf32>
    %206 = math.rsqrt %205 : vector<8x1xf32>
    %207 = vector.broadcast %206 : vector<8x1xf32> to vector<8x64xf32>
    %208 = arith.mulf %203, %207 : vector<8x64xf32>
    %209 = vector.broadcast %152 : vector<1x64xf32> to vector<8x64xf32>
    %210 = arith.mulf %208, %209 : vector<8x64xf32>
    %211 = vector.broadcast %154 : vector<1x64xf32> to vector<8x64xf32>
    %212 = arith.addf %210, %211 : vector<8x64xf32>
    %213 = arith.truncf %212 : vector<8x64xf32> to vector<8x64xbf16>
    %cst_93 = arith.constant dense<0.000000e+00> : vector<8x32xf32>
    %214 = tpu.matmul %213, %156, %cst_93 {dimension_numbers = #tpu.dot_dimension_numbers<[1], [0], [0], [1], [0, 0, 1, 1], [], []>} : vector<8x64xbf16>, vector<64x32xbf16>, vector<8x32xf32> -> vector<8x32xf32>
    %215 = arith.addf %142, %214 : vector<8x32xf32>
    %c0_94 = arith.constant 0 : index
    %c0_95 = arith.constant 0 : index
    %216 = vector.load %arg22[%c0_94, %c0_95] : memref<8x32xf32, #tpu.memory_space<vmem>>, vector<8x32xf32>
    tpu.vector_store %arg22[%c0_94, %c0_95], %215 {strides = array<i32>} : memref<8x32xf32, #tpu.memory_space<vmem>>, vector<8x32xf32>,
    %c1_i32 = arith.constant 1 : i32
    %217 = arith.cmpi eq, %arg1, %c1_i32 : i32
    %218 = arith.extui %217 : i1 to i32
    %c0_i32_96 = arith.constant 0 : i32
    %219 = arith.cmpi ne, %218, %c0_i32_96 : i32
    scf.if %219 {
      %c0_97 = arith.constant 0 : index
      %c0_98 = arith.constant 0 : index
      %220 = vector.load %arg19[%c0_97, %c0_98] : memref<1x32xf32, #tpu.memory_space<vmem>>, vector<1x32xf32>
      %c0_99 = arith.constant 0 : index
      %c0_100 = arith.constant 0 : index
      %221 = vector.load %arg20[%c0_99, %c0_100] : memref<1x32xf32, #tpu.memory_space<vmem>>, vector<1x32xf32>
      %cst_101 = arith.constant dense<0.000000e+00> : vector<8xf32>
      %222 = vector.multi_reduction <add>, %215, %cst_101 [1] : vector<8x32xf32> to vector<8xf32>
      %223 = vector.shape_cast %222 : vector<8xf32> to vector<8x1xf32>
      %cst_102 = arith.constant 3.200000e+01 : f32
      %224 = vector.broadcast %cst_102 : f32 to vector<8x1xf32>
      %225 = arith.divf %223, %224 : vector<8x1xf32>
      %226 = vector.broadcast %225 : vector<8x1xf32> to vector<8x32xf32>
      %227 = arith.subf %215, %226 : vector<8x32xf32>
      %228 = arith.mulf %227, %227 : vector<8x32xf32>
      %cst_103 = arith.constant dense<0.000000e+00> : vector<8xf32>
      %229 = vector.multi_reduction <add>, %228, %cst_103 [1] : vector<8x32xf32> to vector<8xf32>
      %230 = vector.shape_cast %229 : vector<8xf32> to vector<8x1xf32>
      %cst_104 = arith.constant 3.200000e+01 : f32
      %231 = vector.broadcast %cst_104 : f32 to vector<8x1xf32>
      %232 = arith.divf %230, %231 : vector<8x1xf32>
      %233 = vector.broadcast %225 : vector<8x1xf32> to vector<8x32xf32>
      %234 = arith.subf %215, %233 : vector<8x32xf32>
      %cst_105 = arith.constant 9.99999974E-6 : f32
      %235 = vector.broadcast %cst_105 : f32 to vector<8x1xf32>
      %236 = arith.addf %232, %235 : vector<8x1xf32>
      %237 = math.rsqrt %236 : vector<8x1xf32>
      %238 = vector.broadcast %237 : vector<8x1xf32> to vector<8x32xf32>
      %239 = arith.mulf %234, %238 : vector<8x32xf32>
      %240 = vector.broadcast %220 : vector<1x32xf32> to vector<8x32xf32>
      %241 = arith.mulf %239, %240 : vector<8x32xf32>
      %242 = vector.broadcast %221 : vector<1x32xf32> to vector<8x32xf32>
      %243 = arith.addf %241, %242 : vector<8x32xf32>
      %c0_106 = arith.constant 0 : index
      %c0_107 = arith.constant 0 : index
      %c0_108 = arith.constant 0 : index
      %244 = vector.load %arg21[%c0_106, %c0_107, %c0_108] : memref<1x8x32xf32, #tpu.memory_space<vmem>>, vector<1x8x32xf32>
      %245 = vector.shape_cast %244 : vector<1x8x32xf32> to vector<8x32xf32>
      %246 = vector.shape_cast %243 : vector<8x32xf32> to vector<1x8x32xf32>
      tpu.vector_store %arg21[%c0_106, %c0_107, %c0_108], %246 {strides = array<i32>} : memref<1x8x32xf32, #tpu.memory_space<vmem>>, vector<1x8x32xf32>,
    } else {
    }
    return
  }
  func.func @transform_0(%arg0: i32, %arg1: i32) -> (i32, i32, i32) {
    %c0_i32 = arith.constant 0 : i32
    %c0_i32_0 = arith.constant 0 : i32
    %c0_i32_1 = arith.constant 0 : i32
    return %arg0, %c0_i32, %c0_i32_0 : i32, i32, i32
  }
  func.func @transform_1(%arg0: i32, %arg1: i32) -> (i32, i32, i32) {
    %c0_i32 = arith.constant 0 : i32
    %c0_i32_0 = arith.constant 0 : i32
    %c0_i32_1 = arith.constant 0 : i32
    return %arg0, %c0_i32, %c0_i32_0 : i32, i32, i32
  }
  func.func @transform_2(%arg0: i32, %arg1: i32) -> (i32, i32) {
    %c0_i32 = arith.constant 0 : i32
    %c0_i32_0 = arith.constant 0 : i32
    %c0_i32_1 = arith.constant 0 : i32
    return %c0_i32, %c0_i32_0 : i32, i32
  }
  func.func @transform_3(%arg0: i32, %arg1: i32) -> (i32, i32) {
    %c0_i32 = arith.constant 0 : i32
    %c0_i32_0 = arith.constant 0 : i32
    %c0_i32_1 = arith.constant 0 : i32
    return %c0_i32, %c0_i32_0 : i32, i32
  }
  func.func @transform_4(%arg0: i32, %arg1: i32) -> (i32, i32, i32) {
    %c0_i32 = arith.constant 0 : i32
    %c0_i32_0 = arith.constant 0 : i32
    %c0_i32_1 = arith.constant 0 : i32
    return %arg1, %c0_i32, %c0_i32_0 : i32, i32, i32
  }
  func.func @transform_5(%arg0: i32, %arg1: i32) -> (i32, i32, i32) {
    %c0_i32 = arith.constant 0 : i32
    %c0_i32_0 = arith.constant 0 : i32
    %c0_i32_1 = arith.constant 0 : i32
    return %arg1, %c0_i32, %c0_i32_0 : i32, i32, i32
  }
  func.func @transform_6(%arg0: i32, %arg1: i32) -> (i32, i32, i32) {
    %c0_i32 = arith.constant 0 : i32
    %c0_i32_0 = arith.constant 0 : i32
    %c0_i32_1 = arith.constant 0 : i32
    return %arg1, %c0_i32, %c0_i32_0 : i32, i32, i32
  }
  func.func @transform_7(%arg0: i32, %arg1: i32) -> (i32, i32, i32) {
    %c0_i32 = arith.constant 0 : i32
    %c0_i32_0 = arith.constant 0 : i32
    %c0_i32_1 = arith.constant 0 : i32
    return %arg1, %c0_i32, %c0_i32_0 : i32, i32, i32
  }
  func.func @transform_8(%arg0: i32, %arg1: i32) -> (i32, i32, i32) {
    %c0_i32 = arith.constant 0 : i32
    %c0_i32_0 = arith.constant 0 : i32
    %c0_i32_1 = arith.constant 0 : i32
    return %arg1, %c0_i32, %c0_i32_0 : i32, i32, i32
  }
  func.func @transform_9(%arg0: i32, %arg1: i32) -> (i32, i32, i32) {
    %c0_i32 = arith.constant 0 : i32
    %c0_i32_0 = arith.constant 0 : i32
    %c0_i32_1 = arith.constant 0 : i32
    return %arg1, %c0_i32, %c0_i32_0 : i32, i32, i32
  }
  func.func @transform_10(%arg0: i32, %arg1: i32) -> (i32, i32, i32) {
    %c0_i32 = arith.constant 0 : i32
    %c0_i32_0 = arith.constant 0 : i32
    %c0_i32_1 = arith.constant 0 : i32
    return %arg1, %c0_i32, %c0_i32_0 : i32, i32, i32
  }
  func.func @transform_11(%arg0: i32, %arg1: i32) -> (i32, i32, i32) {
    %c0_i32 = arith.constant 0 : i32
    %c0_i32_0 = arith.constant 0 : i32
    %c0_i32_1 = arith.constant 0 : i32
    return %arg1, %c0_i32, %c0_i32_0 : i32, i32, i32
  }
  func.func @transform_12(%arg0: i32, %arg1: i32) -> (i32, i32, i32) {
    %c0_i32 = arith.constant 0 : i32
    %c0_i32_0 = arith.constant 0 : i32
    %c0_i32_1 = arith.constant 0 : i32
    return %arg1, %c0_i32, %c0_i32_0 : i32, i32, i32
  }
  func.func @transform_13(%arg0: i32, %arg1: i32) -> (i32, i32, i32) {
    %c0_i32 = arith.constant 0 : i32
    %c0_i32_0 = arith.constant 0 : i32
    %c0_i32_1 = arith.constant 0 : i32
    return %arg1, %c0_i32, %c0_i32_0 : i32, i32, i32
  }
  func.func @transform_14(%arg0: i32, %arg1: i32) -> (i32, i32, i32) {
    %c0_i32 = arith.constant 0 : i32
    %c0_i32_0 = arith.constant 0 : i32
    %c0_i32_1 = arith.constant 0 : i32
    return %arg1, %c0_i32, %c0_i32_0 : i32, i32, i32
  }
  func.func @transform_15(%arg0: i32, %arg1: i32) -> (i32, i32, i32) {
    %c0_i32 = arith.constant 0 : i32
    %c0_i32_0 = arith.constant 0 : i32
    %c0_i32_1 = arith.constant 0 : i32
    return %arg1, %c0_i32, %c0_i32_0 : i32, i32, i32
  }
  func.func @transform_16(%arg0: i32, %arg1: i32) -> (i32, i32, i32) {
    %c0_i32 = arith.constant 0 : i32
    %c0_i32_0 = arith.constant 0 : i32
    %c0_i32_1 = arith.constant 0 : i32
    return %arg1, %c0_i32, %c0_i32_0 : i32, i32, i32
  }
  func.func @transform_17(%arg0: i32, %arg1: i32) -> (i32, i32) {
    %c0_i32 = arith.constant 0 : i32
    %c0_i32_0 = arith.constant 0 : i32
    %c0_i32_1 = arith.constant 0 : i32
    return %c0_i32, %c0_i32_0 : i32, i32
  }
  func.func @transform_18(%arg0: i32, %arg1: i32) -> (i32, i32) {
    %c0_i32 = arith.constant 0 : i32
    %c0_i32_0 = arith.constant 0 : i32
    %c0_i32_1 = arith.constant 0 : i32
    return %c0_i32, %c0_i32_0 : i32, i32
  }
  func.func @transform_19(%arg0: i32, %arg1: i32) -> (i32, i32, i32) {
    %c0_i32 = arith.constant 0 : i32
    %c0_i32_0 = arith.constant 0 : i32
    %c0_i32_1 = arith.constant 0 : i32
    return %arg0, %c0_i32, %c0_i32_0 : i32, i32, i32
  }
}

module attributes {stable_mosaic.version = 11 : i64} {
  func.func @_decoder_layer_kernel(%arg0: i32, %arg1: i32, %arg2: memref<1x16x32xf32, #tpu.memory_space<vmem>>, %arg3: memref<1x1x8xf32, #tpu.memory_space<vmem>>, %arg4: memref<1x8x32xf32, #tpu.memory_space<vmem>>, %arg5: memref<1x32xf32, #tpu.memory_space<vmem>>, %arg6: memref<1x32xf32, #tpu.memory_space<vmem>>, %arg7: memref<1x1x32xf32, #tpu.memory_space<vmem>>, %arg8: memref<1x1x32xf32, #tpu.memory_space<vmem>>, %arg9: memref<1x32x96xbf16, #tpu.memory_space<vmem>>, %arg10: memref<1x32x32xbf16, #tpu.memory_space<vmem>>, %arg11: memref<1x1x32xf32, #tpu.memory_space<vmem>>, %arg12: memref<1x1x32xf32, #tpu.memory_space<vmem>>, %arg13: memref<1x1x32xf32, #tpu.memory_space<vmem>>, %arg14: memref<1x1x32xf32, #tpu.memory_space<vmem>>, %arg15: memref<1x32x32xbf16, #tpu.memory_space<vmem>>, %arg16: memref<1x32x64xbf16, #tpu.memory_space<vmem>>, %arg17: memref<1x32x32xbf16, #tpu.memory_space<vmem>>, %arg18: memref<1x1x32xf32, #tpu.memory_space<vmem>>, %arg19: memref<1x1x32xf32, #tpu.memory_space<vmem>>, %arg20: memref<1x1x32xf32, #tpu.memory_space<vmem>>, %arg21: memref<1x1x32xf32, #tpu.memory_space<vmem>>, %arg22: memref<1x32x64xbf16, #tpu.memory_space<vmem>>, %arg23: memref<1x32x64xbf16, #tpu.memory_space<vmem>>, %arg24: memref<1x1x64xf32, #tpu.memory_space<vmem>>, %arg25: memref<1x1x64xf32, #tpu.memory_space<vmem>>, %arg26: memref<1x64x32xbf16, #tpu.memory_space<vmem>>, %arg27: memref<1x32xf32, #tpu.memory_space<vmem>>, %arg28: memref<1x32xf32, #tpu.memory_space<vmem>>, %arg29: memref<1x16x32xf32, #tpu.memory_space<vmem>>, %arg30: memref<16x32xf32, #tpu.memory_space<vmem>>, %arg31: memref<16x32xf32, #tpu.memory_space<vmem>>) attributes {dimension_semantics = [#tpu.dimension_semantics<parallel>, #tpu.dimension_semantics<arbitrary>], iteration_bounds = array<i64: 2, 2>, scalar_prefetch = 0 : i64, scratch_operands = 2 : i64, tpu.core_type = #tpu.core_type<tc>, window_params = [{transform_indices = @transform_0, window_bounds = array<i64: 1, 16, 32>}, {transform_indices = @transform_1, window_bounds = array<i64: 1, 1, 8>}, {transform_indices = @transform_2, window_bounds = array<i64: 1, 8, 32>}, {pipeline_mode = #tpu.pipeline_mode<synchronous>, transform_indices = @transform_3, window_bounds = array<i64: 1, 32>}, {pipeline_mode = #tpu.pipeline_mode<synchronous>, transform_indices = @transform_4, window_bounds = array<i64: 1, 32>}, {transform_indices = @transform_5, window_bounds = array<i64: 1, 1, 32>}, {transform_indices = @transform_6, window_bounds = array<i64: 1, 1, 32>}, {transform_indices = @transform_7, window_bounds = array<i64: 1, 32, 96>}, {transform_indices = @transform_8, window_bounds = array<i64: 1, 32, 32>}, {transform_indices = @transform_9, window_bounds = array<i64: 1, 1, 32>}, {transform_indices = @transform_10, window_bounds = array<i64: 1, 1, 32>}, {transform_indices = @transform_11, window_bounds = array<i64: 1, 1, 32>}, {transform_indices = @transform_12, window_bounds = array<i64: 1, 1, 32>}, {transform_indices = @transform_13, window_bounds = array<i64: 1, 32, 32>}, {transform_indices = @transform_14, window_bounds = array<i64: 1, 32, 64>}, {transform_indices = @transform_15, window_bounds = array<i64: 1, 32, 32>}, {transform_indices = @transform_16, window_bounds = array<i64: 1, 1, 32>}, {transform_indices = @transform_17, window_bounds = array<i64: 1, 1, 32>}, {transform_indices = @transform_18, window_bounds = array<i64: 1, 1, 32>}, {transform_indices = @transform_19, window_bounds = array<i64: 1, 1, 32>}, {transform_indices = @transform_20, window_bounds = array<i64: 1, 32, 64>}, {transform_indices = @transform_21, window_bounds = array<i64: 1, 32, 64>}, {transform_indices = @transform_22, window_bounds = array<i64: 1, 1, 64>}, {transform_indices = @transform_23, window_bounds = array<i64: 1, 1, 64>}, {transform_indices = @transform_24, window_bounds = array<i64: 1, 64, 32>}, {pipeline_mode = #tpu.pipeline_mode<synchronous>, transform_indices = @transform_25, window_bounds = array<i64: 1, 32>}, {pipeline_mode = #tpu.pipeline_mode<synchronous>, transform_indices = @transform_26, window_bounds = array<i64: 1, 32>}, {transform_indices = @transform_27, window_bounds = array<i64: 1, 16, 32>}]} {
    %c0_i32 = arith.constant 0 : i32
    %0 = arith.cmpi eq, %arg1, %c0_i32 : i32
    %1 = arith.extui %0 : i1 to i32
    %c0_i32_0 = arith.constant 0 : i32
    %2 = arith.cmpi ne, %1, %c0_i32_0 : i32
    scf.if %2 {
      %c0_162 = arith.constant 0 : index
      %c0_163 = arith.constant 0 : index
      %c0_164 = arith.constant 0 : index
      %364 = vector.load %arg2[%c0_162, %c0_163, %c0_164] : memref<1x16x32xf32, #tpu.memory_space<vmem>>, vector<1x16x32xf32>
      %365 = vector.shape_cast %364 : vector<1x16x32xf32> to vector<16x32xf32>
      %c0_165 = arith.constant 0 : index
      %c0_166 = arith.constant 0 : index
      %366 = vector.load %arg5[%c0_165, %c0_166] : memref<1x32xf32, #tpu.memory_space<vmem>>, vector<1x32xf32>
      %c0_167 = arith.constant 0 : index
      %c0_168 = arith.constant 0 : index
      %367 = vector.load %arg6[%c0_167, %c0_168] : memref<1x32xf32, #tpu.memory_space<vmem>>, vector<1x32xf32>
      %cst_169 = arith.constant dense<0.000000e+00> : vector<16xf32>
      %368 = vector.multi_reduction <add>, %365, %cst_169 [1] : vector<16x32xf32> to vector<16xf32>
      %369 = vector.shape_cast %368 : vector<16xf32> to vector<16x1xf32>
      %cst_170 = arith.constant 3.200000e+01 : f32
      %370 = vector.broadcast %cst_170 : f32 to vector<16x1xf32>
      %371 = arith.divf %369, %370 : vector<16x1xf32>
      %372 = vector.broadcast %371 : vector<16x1xf32> to vector<16x32xf32>
      %373 = arith.subf %365, %372 : vector<16x32xf32>
      %374 = arith.mulf %373, %373 : vector<16x32xf32>
      %cst_171 = arith.constant dense<0.000000e+00> : vector<16xf32>
      %375 = vector.multi_reduction <add>, %374, %cst_171 [1] : vector<16x32xf32> to vector<16xf32>
      %376 = vector.shape_cast %375 : vector<16xf32> to vector<16x1xf32>
      %cst_172 = arith.constant 3.200000e+01 : f32
      %377 = vector.broadcast %cst_172 : f32 to vector<16x1xf32>
      %378 = arith.divf %376, %377 : vector<16x1xf32>
      %379 = vector.broadcast %371 : vector<16x1xf32> to vector<16x32xf32>
      %380 = arith.subf %365, %379 : vector<16x32xf32>
      %cst_173 = arith.constant 9.99999974E-6 : f32
      %381 = vector.broadcast %cst_173 : f32 to vector<16x1xf32>
      %382 = arith.addf %378, %381 : vector<16x1xf32>
      %383 = math.rsqrt %382 : vector<16x1xf32>
      %384 = vector.broadcast %383 : vector<16x1xf32> to vector<16x32xf32>
      %385 = arith.mulf %380, %384 : vector<16x32xf32>
      %386 = vector.broadcast %366 : vector<1x32xf32> to vector<16x32xf32>
      %387 = arith.mulf %385, %386 : vector<16x32xf32>
      %388 = vector.broadcast %367 : vector<1x32xf32> to vector<16x32xf32>
      %389 = arith.addf %387, %388 : vector<16x32xf32>
      %c0_174 = arith.constant 0 : index
      %c0_175 = arith.constant 0 : index
      %390 = vector.load %arg30[%c0_174, %c0_175] : memref<16x32xf32, #tpu.memory_space<vmem>>, vector<16x32xf32>
      tpu.vector_store %arg30[%c0_174, %c0_175], %389 {strides = array<i32>} : memref<16x32xf32, #tpu.memory_space<vmem>>, vector<16x32xf32>,
    } else {
    }
    %3 = tpu.iota {dimensions = array<i32: 0>} : vector<16x16xi32>
    %4 = tpu.iota {dimensions = array<i32: 1>} : vector<16x16xi32>
    %5 = arith.cmpi sle, %4, %3 : vector<16x16xi32>
    %cst = arith.constant 0.000000e+00 : f32
    %cst_1 = arith.constant -9.99999995E+11 : f32
    %6 = vector.broadcast %cst : f32 to vector<16x16xf32>
    %7 = vector.broadcast %cst_1 : f32 to vector<16x16xf32>
    %8 = arith.select %5, %6, %7 : vector<16x16xi1>, vector<16x16xf32>
    %c0 = arith.constant 0 : index
    %c0_2 = arith.constant 0 : index
    %c0_3 = arith.constant 0 : index
    %9 = vector.load %arg3[%c0, %c0_2, %c0_3] : memref<1x1x8xf32, #tpu.memory_space<vmem>>, vector<1x1x8xf32>
    %10 = vector.shape_cast %9 : vector<1x1x8xf32> to vector<1x8xf32>
    %c0_4 = arith.constant 0 : index
    %c0_5 = arith.constant 0 : index
    %c0_6 = arith.constant 0 : index
    %11 = vector.load %arg4[%c0_4, %c0_5, %c0_6] : memref<1x8x32xf32, #tpu.memory_space<vmem>>, vector<1x8x32xf32>
    %12 = vector.shape_cast %11 : vector<1x8x32xf32> to vector<8x32xf32>
    %13 = arith.truncf %12 : vector<8x32xf32> to vector<8x32xbf16>
    %c0_7 = arith.constant 0 : index
    %c0_8 = arith.constant 0 : index
    %14 = vector.load %arg30[%c0_7, %c0_8] : memref<16x32xf32, #tpu.memory_space<vmem>>, vector<16x32xf32>
    %c0_9 = arith.constant 0 : index
    %c0_10 = arith.constant 0 : index
    %c0_11 = arith.constant 0 : index
    %15 = vector.load %arg7[%c0_9, %c0_10, %c0_11] : memref<1x1x32xf32, #tpu.memory_space<vmem>>, vector<1x1x32xf32>
    %16 = vector.shape_cast %15 : vector<1x1x32xf32> to vector<1x32xf32>
    %c0_12 = arith.constant 0 : index
    %c0_13 = arith.constant 0 : index
    %c0_14 = arith.constant 0 : index
    %17 = vector.load %arg8[%c0_12, %c0_13, %c0_14] : memref<1x1x32xf32, #tpu.memory_space<vmem>>, vector<1x1x32xf32>
    %18 = vector.shape_cast %17 : vector<1x1x32xf32> to vector<1x32xf32>
    %cst_15 = arith.constant dense<0.000000e+00> : vector<16xf32>
    %19 = vector.multi_reduction <add>, %14, %cst_15 [1] : vector<16x32xf32> to vector<16xf32>
    %20 = vector.shape_cast %19 : vector<16xf32> to vector<16x1xf32>
    %cst_16 = arith.constant 3.200000e+01 : f32
    %21 = vector.broadcast %cst_16 : f32 to vector<16x1xf32>
    %22 = arith.divf %20, %21 : vector<16x1xf32>
    %23 = vector.broadcast %22 : vector<16x1xf32> to vector<16x32xf32>
    %24 = arith.subf %14, %23 : vector<16x32xf32>
    %25 = arith.mulf %24, %24 : vector<16x32xf32>
    %cst_17 = arith.constant dense<0.000000e+00> : vector<16xf32>
    %26 = vector.multi_reduction <add>, %25, %cst_17 [1] : vector<16x32xf32> to vector<16xf32>
    %27 = vector.shape_cast %26 : vector<16xf32> to vector<16x1xf32>
    %cst_18 = arith.constant 3.200000e+01 : f32
    %28 = vector.broadcast %cst_18 : f32 to vector<16x1xf32>
    %29 = arith.divf %27, %28 : vector<16x1xf32>
    %30 = vector.broadcast %22 : vector<16x1xf32> to vector<16x32xf32>
    %31 = arith.subf %14, %30 : vector<16x32xf32>
    %cst_19 = arith.constant 9.99999974E-6 : f32
    %32 = vector.broadcast %cst_19 : f32 to vector<16x1xf32>
    %33 = arith.addf %29, %32 : vector<16x1xf32>
    %34 = math.rsqrt %33 : vector<16x1xf32>
    %35 = vector.broadcast %34 : vector<16x1xf32> to vector<16x32xf32>
    %36 = arith.mulf %31, %35 : vector<16x32xf32>
    %37 = vector.broadcast %16 : vector<1x32xf32> to vector<16x32xf32>
    %38 = arith.mulf %36, %37 : vector<16x32xf32>
    %39 = vector.broadcast %18 : vector<1x32xf32> to vector<16x32xf32>
    %40 = arith.addf %38, %39 : vector<16x32xf32>
    %c0_20 = arith.constant 0 : index
    %c0_21 = arith.constant 0 : index
    %c0_22 = arith.constant 0 : index
    %41 = vector.load %arg9[%c0_20, %c0_21, %c0_22] : memref<1x32x96xbf16, #tpu.memory_space<vmem>>, vector<1x32x96xbf16>
    %42 = vector.shape_cast %41 : vector<1x32x96xbf16> to vector<32x96xbf16>
    %c0_23 = arith.constant 0 : index
    %c0_24 = arith.constant 0 : index
    %c0_25 = arith.constant 0 : index
    %43 = vector.load %arg10[%c0_23, %c0_24, %c0_25] : memref<1x32x32xbf16, #tpu.memory_space<vmem>>, vector<1x32x32xbf16>
    %44 = vector.shape_cast %43 : vector<1x32x32xbf16> to vector<32x32xbf16>
    %45 = arith.truncf %40 : vector<16x32xf32> to vector<16x32xbf16>
    %cst_26 = arith.constant dense<0.000000e+00> : vector<16x96xf32>
    %46 = tpu.matmul %45, %42, %cst_26 {dimension_numbers = #tpu.dot_dimension_numbers<[1], [0], [0], [1], [0, 0, 1, 1], [], []>} : vector<16x32xbf16>, vector<32x96xbf16>, vector<16x96xf32> -> vector<16x96xf32>
    %47 = vector.extract_strided_slice %46 {offsets = [0, 0], sizes = [16, 32], strides = [1, 1]} : vector<16x96xf32> to vector<16x32xf32>
    %48 = vector.extract_strided_slice %46 {offsets = [0, 32], sizes = [16, 32], strides = [1, 1]} : vector<16x96xf32> to vector<16x32xf32>
    %49 = vector.extract_strided_slice %46 {offsets = [0, 64], sizes = [16, 32], strides = [1, 1]} : vector<16x96xf32> to vector<16x32xf32>
    %50 = vector.extract_strided_slice %47 {offsets = [0, 0], sizes = [16, 8], strides = [1, 1]} : vector<16x32xf32> to vector<16x8xf32>
    %51 = vector.extract_strided_slice %48 {offsets = [0, 0], sizes = [16, 8], strides = [1, 1]} : vector<16x32xf32> to vector<16x8xf32>
    "tpu.trace_start"() <{level = 10 : i32, message = "qc,kc->qk"}> : () -> ()
    %cst_27 = arith.constant dense<0.000000e+00> : vector<16x16xf32>
    %52 = tpu.matmul %50, %51, %cst_27 {dimension_numbers = #tpu.dot_dimension_numbers<[1], [1], [0], [0], [0, 0, 1, 0], [], []>} : vector<16x8xf32>, vector<16x8xf32>, vector<16x16xf32> -> vector<16x16xf32>
    "tpu.trace_stop"() : () -> ()
    %53 = arith.addf %52, %8 : vector<16x16xf32>
    %cst_28 = arith.constant dense<0xFF800000> : vector<16xf32>
    %54 = vector.multi_reduction <maximumf>, %53, %cst_28 [1] : vector<16x16xf32> to vector<16xf32>
    %55 = vector.shape_cast %54 : vector<16xf32> to vector<16x1xf32>
    %56 = vector.broadcast %55 : vector<16x1xf32> to vector<16x16xf32>
    %57 = arith.subf %53, %56 : vector<16x16xf32>
    %58 = math.exp %57 : vector<16x16xf32>
    %cst_29 = arith.constant dense<0.000000e+00> : vector<16xf32>
    %59 = vector.multi_reduction <add>, %58, %cst_29 [1] : vector<16x16xf32> to vector<16xf32>
    %60 = vector.shape_cast %59 : vector<16xf32> to vector<16x1xf32>
    %61 = tpu.reciprocal %60 {approx = true} : vector<16x1xf32> -> vector<16x1xf32>
    %62 = vector.broadcast %61 : vector<16x1xf32> to vector<16x16xf32>
    %63 = arith.mulf %58, %62 : vector<16x16xf32>
    %64 = vector.extract_strided_slice %49 {offsets = [0, 0], sizes = [16, 8], strides = [1, 1]} : vector<16x32xf32> to vector<16x8xf32>
    %cst_30 = arith.constant dense<0.000000e+00> : vector<16x8xf32>
    %65 = tpu.matmul %63, %64, %cst_30 {dimension_numbers = #tpu.dot_dimension_numbers<[1], [0], [0], [1], [0, 0, 1, 1], [], []>} : vector<16x16xf32>, vector<16x8xf32>, vector<16x8xf32> -> vector<16x8xf32>
    %c0_31 = arith.constant 0 : index
    %c0_32 = arith.constant 0 : index
    %66 = vector.load %arg31[%c0_31, %c0_32] : memref<16x32xf32, #tpu.memory_space<vmem>>, vector<16x8xf32>
    tpu.vector_store %arg31[%c0_31, %c0_32], %65 {strides = array<i32>} : memref<16x32xf32, #tpu.memory_space<vmem>>, vector<16x8xf32>,
    %67 = vector.extract_strided_slice %47 {offsets = [0, 8], sizes = [16, 8], strides = [1, 1]} : vector<16x32xf32> to vector<16x8xf32>
    %68 = vector.extract_strided_slice %48 {offsets = [0, 8], sizes = [16, 8], strides = [1, 1]} : vector<16x32xf32> to vector<16x8xf32>
    "tpu.trace_start"() <{level = 10 : i32, message = "qc,kc->qk"}> : () -> ()
    %cst_33 = arith.constant dense<0.000000e+00> : vector<16x16xf32>
    %69 = tpu.matmul %67, %68, %cst_33 {dimension_numbers = #tpu.dot_dimension_numbers<[1], [1], [0], [0], [0, 0, 1, 0], [], []>} : vector<16x8xf32>, vector<16x8xf32>, vector<16x16xf32> -> vector<16x16xf32>
    "tpu.trace_stop"() : () -> ()
    %70 = arith.addf %69, %8 : vector<16x16xf32>
    %cst_34 = arith.constant dense<0xFF800000> : vector<16xf32>
    %71 = vector.multi_reduction <maximumf>, %70, %cst_34 [1] : vector<16x16xf32> to vector<16xf32>
    %72 = vector.shape_cast %71 : vector<16xf32> to vector<16x1xf32>
    %73 = vector.broadcast %72 : vector<16x1xf32> to vector<16x16xf32>
    %74 = arith.subf %70, %73 : vector<16x16xf32>
    %75 = math.exp %74 : vector<16x16xf32>
    %cst_35 = arith.constant dense<0.000000e+00> : vector<16xf32>
    %76 = vector.multi_reduction <add>, %75, %cst_35 [1] : vector<16x16xf32> to vector<16xf32>
    %77 = vector.shape_cast %76 : vector<16xf32> to vector<16x1xf32>
    %78 = tpu.reciprocal %77 {approx = true} : vector<16x1xf32> -> vector<16x1xf32>
    %79 = vector.broadcast %78 : vector<16x1xf32> to vector<16x16xf32>
    %80 = arith.mulf %75, %79 : vector<16x16xf32>
    %81 = vector.extract_strided_slice %49 {offsets = [0, 8], sizes = [16, 8], strides = [1, 1]} : vector<16x32xf32> to vector<16x8xf32>
    %cst_36 = arith.constant dense<0.000000e+00> : vector<16x8xf32>
    %82 = tpu.matmul %80, %81, %cst_36 {dimension_numbers = #tpu.dot_dimension_numbers<[1], [0], [0], [1], [0, 0, 1, 1], [], []>} : vector<16x16xf32>, vector<16x8xf32>, vector<16x8xf32> -> vector<16x8xf32>
    %c0_37 = arith.constant 0 : index
    %c8 = arith.constant 8 : index
    %83 = vector.load %arg31[%c0_37, %c8] : memref<16x32xf32, #tpu.memory_space<vmem>>, vector<16x8xf32>
    tpu.vector_store %arg31[%c0_37, %c8], %82 {strides = array<i32>} : memref<16x32xf32, #tpu.memory_space<vmem>>, vector<16x8xf32>,
    %84 = vector.extract_strided_slice %47 {offsets = [0, 16], sizes = [16, 8], strides = [1, 1]} : vector<16x32xf32> to vector<16x8xf32>
    %85 = vector.extract_strided_slice %48 {offsets = [0, 16], sizes = [16, 8], strides = [1, 1]} : vector<16x32xf32> to vector<16x8xf32>
    "tpu.trace_start"() <{level = 10 : i32, message = "qc,kc->qk"}> : () -> ()
    %cst_38 = arith.constant dense<0.000000e+00> : vector<16x16xf32>
    %86 = tpu.matmul %84, %85, %cst_38 {dimension_numbers = #tpu.dot_dimension_numbers<[1], [1], [0], [0], [0, 0, 1, 0], [], []>} : vector<16x8xf32>, vector<16x8xf32>, vector<16x16xf32> -> vector<16x16xf32>
    "tpu.trace_stop"() : () -> ()
    %87 = arith.addf %86, %8 : vector<16x16xf32>
    %cst_39 = arith.constant dense<0xFF800000> : vector<16xf32>
    %88 = vector.multi_reduction <maximumf>, %87, %cst_39 [1] : vector<16x16xf32> to vector<16xf32>
    %89 = vector.shape_cast %88 : vector<16xf32> to vector<16x1xf32>
    %90 = vector.broadcast %89 : vector<16x1xf32> to vector<16x16xf32>
    %91 = arith.subf %87, %90 : vector<16x16xf32>
    %92 = math.exp %91 : vector<16x16xf32>
    %cst_40 = arith.constant dense<0.000000e+00> : vector<16xf32>
    %93 = vector.multi_reduction <add>, %92, %cst_40 [1] : vector<16x16xf32> to vector<16xf32>
    %94 = vector.shape_cast %93 : vector<16xf32> to vector<16x1xf32>
    %95 = tpu.reciprocal %94 {approx = true} : vector<16x1xf32> -> vector<16x1xf32>
    %96 = vector.broadcast %95 : vector<16x1xf32> to vector<16x16xf32>
    %97 = arith.mulf %92, %96 : vector<16x16xf32>
    %98 = vector.extract_strided_slice %49 {offsets = [0, 16], sizes = [16, 8], strides = [1, 1]} : vector<16x32xf32> to vector<16x8xf32>
    %cst_41 = arith.constant dense<0.000000e+00> : vector<16x8xf32>
    %99 = tpu.matmul %97, %98, %cst_41 {dimension_numbers = #tpu.dot_dimension_numbers<[1], [0], [0], [1], [0, 0, 1, 1], [], []>} : vector<16x16xf32>, vector<16x8xf32>, vector<16x8xf32> -> vector<16x8xf32>
    %c0_42 = arith.constant 0 : index
    %c16 = arith.constant 16 : index
    %100 = vector.load %arg31[%c0_42, %c16] : memref<16x32xf32, #tpu.memory_space<vmem>>, vector<16x8xf32>
    tpu.vector_store %arg31[%c0_42, %c16], %99 {strides = array<i32>} : memref<16x32xf32, #tpu.memory_space<vmem>>, vector<16x8xf32>,
    %101 = vector.extract_strided_slice %47 {offsets = [0, 24], sizes = [16, 8], strides = [1, 1]} : vector<16x32xf32> to vector<16x8xf32>
    %102 = vector.extract_strided_slice %48 {offsets = [0, 24], sizes = [16, 8], strides = [1, 1]} : vector<16x32xf32> to vector<16x8xf32>
    "tpu.trace_start"() <{level = 10 : i32, message = "qc,kc->qk"}> : () -> ()
    %cst_43 = arith.constant dense<0.000000e+00> : vector<16x16xf32>
    %103 = tpu.matmul %101, %102, %cst_43 {dimension_numbers = #tpu.dot_dimension_numbers<[1], [1], [0], [0], [0, 0, 1, 0], [], []>} : vector<16x8xf32>, vector<16x8xf32>, vector<16x16xf32> -> vector<16x16xf32>
    "tpu.trace_stop"() : () -> ()
    %104 = arith.addf %103, %8 : vector<16x16xf32>
    %cst_44 = arith.constant dense<0xFF800000> : vector<16xf32>
    %105 = vector.multi_reduction <maximumf>, %104, %cst_44 [1] : vector<16x16xf32> to vector<16xf32>
    %106 = vector.shape_cast %105 : vector<16xf32> to vector<16x1xf32>
    %107 = vector.broadcast %106 : vector<16x1xf32> to vector<16x16xf32>
    %108 = arith.subf %104, %107 : vector<16x16xf32>
    %109 = math.exp %108 : vector<16x16xf32>
    %cst_45 = arith.constant dense<0.000000e+00> : vector<16xf32>
    %110 = vector.multi_reduction <add>, %109, %cst_45 [1] : vector<16x16xf32> to vector<16xf32>
    %111 = vector.shape_cast %110 : vector<16xf32> to vector<16x1xf32>
    %112 = tpu.reciprocal %111 {approx = true} : vector<16x1xf32> -> vector<16x1xf32>
    %113 = vector.broadcast %112 : vector<16x1xf32> to vector<16x16xf32>
    %114 = arith.mulf %109, %113 : vector<16x16xf32>
    %115 = vector.extract_strided_slice %49 {offsets = [0, 24], sizes = [16, 8], strides = [1, 1]} : vector<16x32xf32> to vector<16x8xf32>
    %cst_46 = arith.constant dense<0.000000e+00> : vector<16x8xf32>
    %116 = tpu.matmul %114, %115, %cst_46 {dimension_numbers = #tpu.dot_dimension_numbers<[1], [0], [0], [1], [0, 0, 1, 1], [], []>} : vector<16x16xf32>, vector<16x8xf32>, vector<16x8xf32> -> vector<16x8xf32>
    %c0_47 = arith.constant 0 : index
    %c24 = arith.constant 24 : index
    %117 = vector.load %arg31[%c0_47, %c24] : memref<16x32xf32, #tpu.memory_space<vmem>>, vector<16x8xf32>
    tpu.vector_store %arg31[%c0_47, %c24], %116 {strides = array<i32>} : memref<16x32xf32, #tpu.memory_space<vmem>>, vector<16x8xf32>,
    %c0_48 = arith.constant 0 : index
    %c0_49 = arith.constant 0 : index
    %118 = vector.load %arg31[%c0_48, %c0_49] : memref<16x32xf32, #tpu.memory_space<vmem>>, vector<16x32xf32>
    %119 = arith.truncf %118 : vector<16x32xf32> to vector<16x32xbf16>
    %cst_50 = arith.constant dense<0.000000e+00> : vector<16x32xf32>
    %120 = tpu.matmul %119, %44, %cst_50 {dimension_numbers = #tpu.dot_dimension_numbers<[1], [0], [0], [1], [0, 0, 1, 1], [], []>} : vector<16x32xbf16>, vector<32x32xbf16>, vector<16x32xf32> -> vector<16x32xf32>
    %c0_51 = arith.constant 0 : index
    %c0_52 = arith.constant 0 : index
    %c0_53 = arith.constant 0 : index
    %121 = vector.load %arg11[%c0_51, %c0_52, %c0_53] : memref<1x1x32xf32, #tpu.memory_space<vmem>>, vector<1x1x32xf32>
    %122 = vector.shape_cast %121 : vector<1x1x32xf32> to vector<1x32xf32>
    %c0_54 = arith.constant 0 : index
    %c0_55 = arith.constant 0 : index
    %c0_56 = arith.constant 0 : index
    %123 = vector.load %arg12[%c0_54, %c0_55, %c0_56] : memref<1x1x32xf32, #tpu.memory_space<vmem>>, vector<1x1x32xf32>
    %124 = vector.shape_cast %123 : vector<1x1x32xf32> to vector<1x32xf32>
    %cst_57 = arith.constant dense<0.000000e+00> : vector<16xf32>
    %125 = vector.multi_reduction <add>, %120, %cst_57 [1] : vector<16x32xf32> to vector<16xf32>
    %126 = vector.shape_cast %125 : vector<16xf32> to vector<16x1xf32>
    %cst_58 = arith.constant 3.200000e+01 : f32
    %127 = vector.broadcast %cst_58 : f32 to vector<16x1xf32>
    %128 = arith.divf %126, %127 : vector<16x1xf32>
    %129 = vector.broadcast %128 : vector<16x1xf32> to vector<16x32xf32>
    %130 = arith.subf %120, %129 : vector<16x32xf32>
    %131 = arith.mulf %130, %130 : vector<16x32xf32>
    %cst_59 = arith.constant dense<0.000000e+00> : vector<16xf32>
    %132 = vector.multi_reduction <add>, %131, %cst_59 [1] : vector<16x32xf32> to vector<16xf32>
    %133 = vector.shape_cast %132 : vector<16xf32> to vector<16x1xf32>
    %cst_60 = arith.constant 3.200000e+01 : f32
    %134 = vector.broadcast %cst_60 : f32 to vector<16x1xf32>
    %135 = arith.divf %133, %134 : vector<16x1xf32>
    %136 = vector.broadcast %128 : vector<16x1xf32> to vector<16x32xf32>
    %137 = arith.subf %120, %136 : vector<16x32xf32>
    %cst_61 = arith.constant 9.99999974E-6 : f32
    %138 = vector.broadcast %cst_61 : f32 to vector<16x1xf32>
    %139 = arith.addf %135, %138 : vector<16x1xf32>
    %140 = math.rsqrt %139 : vector<16x1xf32>
    %141 = vector.broadcast %140 : vector<16x1xf32> to vector<16x32xf32>
    %142 = arith.mulf %137, %141 : vector<16x32xf32>
    %143 = vector.broadcast %122 : vector<1x32xf32> to vector<16x32xf32>
    %144 = arith.mulf %142, %143 : vector<16x32xf32>
    %145 = vector.broadcast %124 : vector<1x32xf32> to vector<16x32xf32>
    %146 = arith.addf %144, %145 : vector<16x32xf32>
    %147 = arith.addf %14, %146 : vector<16x32xf32>
    %c0_62 = arith.constant 0 : index
    %c0_63 = arith.constant 0 : index
    %c0_64 = arith.constant 0 : index
    %148 = vector.load %arg13[%c0_62, %c0_63, %c0_64] : memref<1x1x32xf32, #tpu.memory_space<vmem>>, vector<1x1x32xf32>
    %149 = vector.shape_cast %148 : vector<1x1x32xf32> to vector<1x32xf32>
    %c0_65 = arith.constant 0 : index
    %c0_66 = arith.constant 0 : index
    %c0_67 = arith.constant 0 : index
    %150 = vector.load %arg14[%c0_65, %c0_66, %c0_67] : memref<1x1x32xf32, #tpu.memory_space<vmem>>, vector<1x1x32xf32>
    %151 = vector.shape_cast %150 : vector<1x1x32xf32> to vector<1x32xf32>
    %cst_68 = arith.constant dense<0.000000e+00> : vector<16xf32>
    %152 = vector.multi_reduction <add>, %147, %cst_68 [1] : vector<16x32xf32> to vector<16xf32>
    %153 = vector.shape_cast %152 : vector<16xf32> to vector<16x1xf32>
    %cst_69 = arith.constant 3.200000e+01 : f32
    %154 = vector.broadcast %cst_69 : f32 to vector<16x1xf32>
    %155 = arith.divf %153, %154 : vector<16x1xf32>
    %156 = vector.broadcast %155 : vector<16x1xf32> to vector<16x32xf32>
    %157 = arith.subf %147, %156 : vector<16x32xf32>
    %158 = arith.mulf %157, %157 : vector<16x32xf32>
    %cst_70 = arith.constant dense<0.000000e+00> : vector<16xf32>
    %159 = vector.multi_reduction <add>, %158, %cst_70 [1] : vector<16x32xf32> to vector<16xf32>
    %160 = vector.shape_cast %159 : vector<16xf32> to vector<16x1xf32>
    %cst_71 = arith.constant 3.200000e+01 : f32
    %161 = vector.broadcast %cst_71 : f32 to vector<16x1xf32>
    %162 = arith.divf %160, %161 : vector<16x1xf32>
    %163 = vector.broadcast %155 : vector<16x1xf32> to vector<16x32xf32>
    %164 = arith.subf %147, %163 : vector<16x32xf32>
    %cst_72 = arith.constant 9.99999974E-6 : f32
    %165 = vector.broadcast %cst_72 : f32 to vector<16x1xf32>
    %166 = arith.addf %162, %165 : vector<16x1xf32>
    %167 = math.rsqrt %166 : vector<16x1xf32>
    %168 = vector.broadcast %167 : vector<16x1xf32> to vector<16x32xf32>
    %169 = arith.mulf %164, %168 : vector<16x32xf32>
    %170 = vector.broadcast %149 : vector<1x32xf32> to vector<16x32xf32>
    %171 = arith.mulf %169, %170 : vector<16x32xf32>
    %172 = vector.broadcast %151 : vector<1x32xf32> to vector<16x32xf32>
    %173 = arith.addf %171, %172 : vector<16x32xf32>
    %c0_73 = arith.constant 0 : index
    %c0_74 = arith.constant 0 : index
    %c0_75 = arith.constant 0 : index
    %174 = vector.load %arg15[%c0_73, %c0_74, %c0_75] : memref<1x32x32xbf16, #tpu.memory_space<vmem>>, vector<1x32x32xbf16>
    %175 = vector.shape_cast %174 : vector<1x32x32xbf16> to vector<32x32xbf16>
    %c0_76 = arith.constant 0 : index
    %c0_77 = arith.constant 0 : index
    %c0_78 = arith.constant 0 : index
    %176 = vector.load %arg16[%c0_76, %c0_77, %c0_78] : memref<1x32x64xbf16, #tpu.memory_space<vmem>>, vector<1x32x64xbf16>
    %177 = vector.shape_cast %176 : vector<1x32x64xbf16> to vector<32x64xbf16>
    %c0_79 = arith.constant 0 : index
    %c0_80 = arith.constant 0 : index
    %c0_81 = arith.constant 0 : index
    %178 = vector.load %arg17[%c0_79, %c0_80, %c0_81] : memref<1x32x32xbf16, #tpu.memory_space<vmem>>, vector<1x32x32xbf16>
    %179 = vector.shape_cast %178 : vector<1x32x32xbf16> to vector<32x32xbf16>
    %180 = arith.truncf %173 : vector<16x32xf32> to vector<16x32xbf16>
    %cst_82 = arith.constant dense<0.000000e+00> : vector<16x32xf32>
    %181 = tpu.matmul %180, %175, %cst_82 {dimension_numbers = #tpu.dot_dimension_numbers<[1], [0], [0], [1], [0, 0, 1, 1], [], []>} : vector<16x32xbf16>, vector<32x32xbf16>, vector<16x32xf32> -> vector<16x32xf32>
    %cst_83 = arith.constant dense<0.000000e+00> : vector<8x64xf32>
    %182 = tpu.matmul %13, %177, %cst_83 {dimension_numbers = #tpu.dot_dimension_numbers<[1], [0], [0], [1], [0, 0, 1, 1], [], []>} : vector<8x32xbf16>, vector<32x64xbf16>, vector<8x64xf32> -> vector<8x64xf32>
    %183 = vector.extract_strided_slice %182 {offsets = [0, 0], sizes = [8, 32], strides = [1, 1]} : vector<8x64xf32> to vector<8x32xf32>
    %184 = vector.extract_strided_slice %182 {offsets = [0, 32], sizes = [8, 32], strides = [1, 1]} : vector<8x64xf32> to vector<8x32xf32>
    %185 = vector.extract_strided_slice %181 {offsets = [0, 0], sizes = [16, 8], strides = [1, 1]} : vector<16x32xf32> to vector<16x8xf32>
    %186 = vector.extract_strided_slice %183 {offsets = [0, 0], sizes = [8, 8], strides = [1, 1]} : vector<8x32xf32> to vector<8x8xf32>
    "tpu.trace_start"() <{level = 10 : i32, message = "qc,kc->qk"}> : () -> ()
    %cst_84 = arith.constant dense<0.000000e+00> : vector<16x8xf32>
    %187 = tpu.matmul %185, %186, %cst_84 {dimension_numbers = #tpu.dot_dimension_numbers<[1], [1], [0], [0], [0, 0, 1, 0], [], []>} : vector<16x8xf32>, vector<8x8xf32>, vector<16x8xf32> -> vector<16x8xf32>
    "tpu.trace_stop"() : () -> ()
    %188 = vector.broadcast %10 : vector<1x8xf32> to vector<16x8xf32>
    %189 = arith.addf %187, %188 : vector<16x8xf32>
    %cst_85 = arith.constant dense<0xFF800000> : vector<16xf32>
    %190 = vector.multi_reduction <maximumf>, %189, %cst_85 [1] : vector<16x8xf32> to vector<16xf32>
    %191 = vector.shape_cast %190 : vector<16xf32> to vector<16x1xf32>
    %192 = vector.broadcast %191 : vector<16x1xf32> to vector<16x8xf32>
    %193 = arith.subf %189, %192 : vector<16x8xf32>
    %194 = math.exp %193 : vector<16x8xf32>
    %cst_86 = arith.constant dense<0.000000e+00> : vector<16xf32>
    %195 = vector.multi_reduction <add>, %194, %cst_86 [1] : vector<16x8xf32> to vector<16xf32>
    %196 = vector.shape_cast %195 : vector<16xf32> to vector<16x1xf32>
    %197 = tpu.reciprocal %196 {approx = true} : vector<16x1xf32> -> vector<16x1xf32>
    %198 = vector.broadcast %197 : vector<16x1xf32> to vector<16x8xf32>
    %199 = arith.mulf %194, %198 : vector<16x8xf32>
    %200 = vector.extract_strided_slice %184 {offsets = [0, 0], sizes = [8, 8], strides = [1, 1]} : vector<8x32xf32> to vector<8x8xf32>
    %cst_87 = arith.constant dense<0.000000e+00> : vector<16x8xf32>
    %201 = tpu.matmul %199, %200, %cst_87 {dimension_numbers = #tpu.dot_dimension_numbers<[1], [0], [0], [1], [0, 0, 1, 1], [], []>} : vector<16x8xf32>, vector<8x8xf32>, vector<16x8xf32> -> vector<16x8xf32>
    %c0_88 = arith.constant 0 : index
    %c0_89 = arith.constant 0 : index
    %202 = vector.load %arg31[%c0_88, %c0_89] : memref<16x32xf32, #tpu.memory_space<vmem>>, vector<16x8xf32>
    tpu.vector_store %arg31[%c0_88, %c0_89], %201 {strides = array<i32>} : memref<16x32xf32, #tpu.memory_space<vmem>>, vector<16x8xf32>,
    %203 = vector.extract_strided_slice %181 {offsets = [0, 8], sizes = [16, 8], strides = [1, 1]} : vector<16x32xf32> to vector<16x8xf32>
    %204 = vector.extract_strided_slice %183 {offsets = [0, 8], sizes = [8, 8], strides = [1, 1]} : vector<8x32xf32> to vector<8x8xf32>
    "tpu.trace_start"() <{level = 10 : i32, message = "qc,kc->qk"}> : () -> ()
    %cst_90 = arith.constant dense<0.000000e+00> : vector<16x8xf32>
    %205 = tpu.matmul %203, %204, %cst_90 {dimension_numbers = #tpu.dot_dimension_numbers<[1], [1], [0], [0], [0, 0, 1, 0], [], []>} : vector<16x8xf32>, vector<8x8xf32>, vector<16x8xf32> -> vector<16x8xf32>
    "tpu.trace_stop"() : () -> ()
    %206 = vector.broadcast %10 : vector<1x8xf32> to vector<16x8xf32>
    %207 = arith.addf %205, %206 : vector<16x8xf32>
    %cst_91 = arith.constant dense<0xFF800000> : vector<16xf32>
    %208 = vector.multi_reduction <maximumf>, %207, %cst_91 [1] : vector<16x8xf32> to vector<16xf32>
    %209 = vector.shape_cast %208 : vector<16xf32> to vector<16x1xf32>
    %210 = vector.broadcast %209 : vector<16x1xf32> to vector<16x8xf32>
    %211 = arith.subf %207, %210 : vector<16x8xf32>
    %212 = math.exp %211 : vector<16x8xf32>
    %cst_92 = arith.constant dense<0.000000e+00> : vector<16xf32>
    %213 = vector.multi_reduction <add>, %212, %cst_92 [1] : vector<16x8xf32> to vector<16xf32>
    %214 = vector.shape_cast %213 : vector<16xf32> to vector<16x1xf32>
    %215 = tpu.reciprocal %214 {approx = true} : vector<16x1xf32> -> vector<16x1xf32>
    %216 = vector.broadcast %215 : vector<16x1xf32> to vector<16x8xf32>
    %217 = arith.mulf %212, %216 : vector<16x8xf32>
    %218 = vector.extract_strided_slice %184 {offsets = [0, 8], sizes = [8, 8], strides = [1, 1]} : vector<8x32xf32> to vector<8x8xf32>
    %cst_93 = arith.constant dense<0.000000e+00> : vector<16x8xf32>
    %219 = tpu.matmul %217, %218, %cst_93 {dimension_numbers = #tpu.dot_dimension_numbers<[1], [0], [0], [1], [0, 0, 1, 1], [], []>} : vector<16x8xf32>, vector<8x8xf32>, vector<16x8xf32> -> vector<16x8xf32>
    %c0_94 = arith.constant 0 : index
    %c8_95 = arith.constant 8 : index
    %220 = vector.load %arg31[%c0_94, %c8_95] : memref<16x32xf32, #tpu.memory_space<vmem>>, vector<16x8xf32>
    tpu.vector_store %arg31[%c0_94, %c8_95], %219 {strides = array<i32>} : memref<16x32xf32, #tpu.memory_space<vmem>>, vector<16x8xf32>,
    %221 = vector.extract_strided_slice %181 {offsets = [0, 16], sizes = [16, 8], strides = [1, 1]} : vector<16x32xf32> to vector<16x8xf32>
    %222 = vector.extract_strided_slice %183 {offsets = [0, 16], sizes = [8, 8], strides = [1, 1]} : vector<8x32xf32> to vector<8x8xf32>
    "tpu.trace_start"() <{level = 10 : i32, message = "qc,kc->qk"}> : () -> ()
    %cst_96 = arith.constant dense<0.000000e+00> : vector<16x8xf32>
    %223 = tpu.matmul %221, %222, %cst_96 {dimension_numbers = #tpu.dot_dimension_numbers<[1], [1], [0], [0], [0, 0, 1, 0], [], []>} : vector<16x8xf32>, vector<8x8xf32>, vector<16x8xf32> -> vector<16x8xf32>
    "tpu.trace_stop"() : () -> ()
    %224 = vector.broadcast %10 : vector<1x8xf32> to vector<16x8xf32>
    %225 = arith.addf %223, %224 : vector<16x8xf32>
    %cst_97 = arith.constant dense<0xFF800000> : vector<16xf32>
    %226 = vector.multi_reduction <maximumf>, %225, %cst_97 [1] : vector<16x8xf32> to vector<16xf32>
    %227 = vector.shape_cast %226 : vector<16xf32> to vector<16x1xf32>
    %228 = vector.broadcast %227 : vector<16x1xf32> to vector<16x8xf32>
    %229 = arith.subf %225, %228 : vector<16x8xf32>
    %230 = math.exp %229 : vector<16x8xf32>
    %cst_98 = arith.constant dense<0.000000e+00> : vector<16xf32>
    %231 = vector.multi_reduction <add>, %230, %cst_98 [1] : vector<16x8xf32> to vector<16xf32>
    %232 = vector.shape_cast %231 : vector<16xf32> to vector<16x1xf32>
    %233 = tpu.reciprocal %232 {approx = true} : vector<16x1xf32> -> vector<16x1xf32>
    %234 = vector.broadcast %233 : vector<16x1xf32> to vector<16x8xf32>
    %235 = arith.mulf %230, %234 : vector<16x8xf32>
    %236 = vector.extract_strided_slice %184 {offsets = [0, 16], sizes = [8, 8], strides = [1, 1]} : vector<8x32xf32> to vector<8x8xf32>
    %cst_99 = arith.constant dense<0.000000e+00> : vector<16x8xf32>
    %237 = tpu.matmul %235, %236, %cst_99 {dimension_numbers = #tpu.dot_dimension_numbers<[1], [0], [0], [1], [0, 0, 1, 1], [], []>} : vector<16x8xf32>, vector<8x8xf32>, vector<16x8xf32> -> vector<16x8xf32>
    %c0_100 = arith.constant 0 : index
    %c16_101 = arith.constant 16 : index
    %238 = vector.load %arg31[%c0_100, %c16_101] : memref<16x32xf32, #tpu.memory_space<vmem>>, vector<16x8xf32>
    tpu.vector_store %arg31[%c0_100, %c16_101], %237 {strides = array<i32>} : memref<16x32xf32, #tpu.memory_space<vmem>>, vector<16x8xf32>,
    %239 = vector.extract_strided_slice %181 {offsets = [0, 24], sizes = [16, 8], strides = [1, 1]} : vector<16x32xf32> to vector<16x8xf32>
    %240 = vector.extract_strided_slice %183 {offsets = [0, 24], sizes = [8, 8], strides = [1, 1]} : vector<8x32xf32> to vector<8x8xf32>
    "tpu.trace_start"() <{level = 10 : i32, message = "qc,kc->qk"}> : () -> ()
    %cst_102 = arith.constant dense<0.000000e+00> : vector<16x8xf32>
    %241 = tpu.matmul %239, %240, %cst_102 {dimension_numbers = #tpu.dot_dimension_numbers<[1], [1], [0], [0], [0, 0, 1, 0], [], []>} : vector<16x8xf32>, vector<8x8xf32>, vector<16x8xf32> -> vector<16x8xf32>
    "tpu.trace_stop"() : () -> ()
    %242 = vector.broadcast %10 : vector<1x8xf32> to vector<16x8xf32>
    %243 = arith.addf %241, %242 : vector<16x8xf32>
    %cst_103 = arith.constant dense<0xFF800000> : vector<16xf32>
    %244 = vector.multi_reduction <maximumf>, %243, %cst_103 [1] : vector<16x8xf32> to vector<16xf32>
    %245 = vector.shape_cast %244 : vector<16xf32> to vector<16x1xf32>
    %246 = vector.broadcast %245 : vector<16x1xf32> to vector<16x8xf32>
    %247 = arith.subf %243, %246 : vector<16x8xf32>
    %248 = math.exp %247 : vector<16x8xf32>
    %cst_104 = arith.constant dense<0.000000e+00> : vector<16xf32>
    %249 = vector.multi_reduction <add>, %248, %cst_104 [1] : vector<16x8xf32> to vector<16xf32>
    %250 = vector.shape_cast %249 : vector<16xf32> to vector<16x1xf32>
    %251 = tpu.reciprocal %250 {approx = true} : vector<16x1xf32> -> vector<16x1xf32>
    %252 = vector.broadcast %251 : vector<16x1xf32> to vector<16x8xf32>
    %253 = arith.mulf %248, %252 : vector<16x8xf32>
    %254 = vector.extract_strided_slice %184 {offsets = [0, 24], sizes = [8, 8], strides = [1, 1]} : vector<8x32xf32> to vector<8x8xf32>
    %cst_105 = arith.constant dense<0.000000e+00> : vector<16x8xf32>
    %255 = tpu.matmul %253, %254, %cst_105 {dimension_numbers = #tpu.dot_dimension_numbers<[1], [0], [0], [1], [0, 0, 1, 1], [], []>} : vector<16x8xf32>, vector<8x8xf32>, vector<16x8xf32> -> vector<16x8xf32>
    %c0_106 = arith.constant 0 : index
    %c24_107 = arith.constant 24 : index
    %256 = vector.load %arg31[%c0_106, %c24_107] : memref<16x32xf32, #tpu.memory_space<vmem>>, vector<16x8xf32>
    tpu.vector_store %arg31[%c0_106, %c24_107], %255 {strides = array<i32>} : memref<16x32xf32, #tpu.memory_space<vmem>>, vector<16x8xf32>,
    %c0_108 = arith.constant 0 : index
    %c0_109 = arith.constant 0 : index
    %257 = vector.load %arg31[%c0_108, %c0_109] : memref<16x32xf32, #tpu.memory_space<vmem>>, vector<16x32xf32>
    %258 = arith.truncf %257 : vector<16x32xf32> to vector<16x32xbf16>
    %cst_110 = arith.constant dense<0.000000e+00> : vector<16x32xf32>
    %259 = tpu.matmul %258, %179, %cst_110 {dimension_numbers = #tpu.dot_dimension_numbers<[1], [0], [0], [1], [0, 0, 1, 1], [], []>} : vector<16x32xbf16>, vector<32x32xbf16>, vector<16x32xf32> -> vector<16x32xf32>
    %c0_111 = arith.constant 0 : index
    %c0_112 = arith.constant 0 : index
    %c0_113 = arith.constant 0 : index
    %260 = vector.load %arg18[%c0_111, %c0_112, %c0_113] : memref<1x1x32xf32, #tpu.memory_space<vmem>>, vector<1x1x32xf32>
    %261 = vector.shape_cast %260 : vector<1x1x32xf32> to vector<1x32xf32>
    %c0_114 = arith.constant 0 : index
    %c0_115 = arith.constant 0 : index
    %c0_116 = arith.constant 0 : index
    %262 = vector.load %arg19[%c0_114, %c0_115, %c0_116] : memref<1x1x32xf32, #tpu.memory_space<vmem>>, vector<1x1x32xf32>
    %263 = vector.shape_cast %262 : vector<1x1x32xf32> to vector<1x32xf32>
    %cst_117 = arith.constant dense<0.000000e+00> : vector<16xf32>
    %264 = vector.multi_reduction <add>, %259, %cst_117 [1] : vector<16x32xf32> to vector<16xf32>
    %265 = vector.shape_cast %264 : vector<16xf32> to vector<16x1xf32>
    %cst_118 = arith.constant 3.200000e+01 : f32
    %266 = vector.broadcast %cst_118 : f32 to vector<16x1xf32>
    %267 = arith.divf %265, %266 : vector<16x1xf32>
    %268 = vector.broadcast %267 : vector<16x1xf32> to vector<16x32xf32>
    %269 = arith.subf %259, %268 : vector<16x32xf32>
    %270 = arith.mulf %269, %269 : vector<16x32xf32>
    %cst_119 = arith.constant dense<0.000000e+00> : vector<16xf32>
    %271 = vector.multi_reduction <add>, %270, %cst_119 [1] : vector<16x32xf32> to vector<16xf32>
    %272 = vector.shape_cast %271 : vector<16xf32> to vector<16x1xf32>
    %cst_120 = arith.constant 3.200000e+01 : f32
    %273 = vector.broadcast %cst_120 : f32 to vector<16x1xf32>
    %274 = arith.divf %272, %273 : vector<16x1xf32>
    %275 = vector.broadcast %267 : vector<16x1xf32> to vector<16x32xf32>
    %276 = arith.subf %259, %275 : vector<16x32xf32>
    %cst_121 = arith.constant 9.99999974E-6 : f32
    %277 = vector.broadcast %cst_121 : f32 to vector<16x1xf32>
    %278 = arith.addf %274, %277 : vector<16x1xf32>
    %279 = math.rsqrt %278 : vector<16x1xf32>
    %280 = vector.broadcast %279 : vector<16x1xf32> to vector<16x32xf32>
    %281 = arith.mulf %276, %280 : vector<16x32xf32>
    %282 = vector.broadcast %261 : vector<1x32xf32> to vector<16x32xf32>
    %283 = arith.mulf %281, %282 : vector<16x32xf32>
    %284 = vector.broadcast %263 : vector<1x32xf32> to vector<16x32xf32>
    %285 = arith.addf %283, %284 : vector<16x32xf32>
    %286 = arith.addf %147, %285 : vector<16x32xf32>
    %c0_122 = arith.constant 0 : index
    %c0_123 = arith.constant 0 : index
    %c0_124 = arith.constant 0 : index
    %287 = vector.load %arg20[%c0_122, %c0_123, %c0_124] : memref<1x1x32xf32, #tpu.memory_space<vmem>>, vector<1x1x32xf32>
    %288 = vector.shape_cast %287 : vector<1x1x32xf32> to vector<1x32xf32>
    %c0_125 = arith.constant 0 : index
    %c0_126 = arith.constant 0 : index
    %c0_127 = arith.constant 0 : index
    %289 = vector.load %arg21[%c0_125, %c0_126, %c0_127] : memref<1x1x32xf32, #tpu.memory_space<vmem>>, vector<1x1x32xf32>
    %290 = vector.shape_cast %289 : vector<1x1x32xf32> to vector<1x32xf32>
    %c0_128 = arith.constant 0 : index
    %c0_129 = arith.constant 0 : index
    %c0_130 = arith.constant 0 : index
    %291 = vector.load %arg22[%c0_128, %c0_129, %c0_130] : memref<1x32x64xbf16, #tpu.memory_space<vmem>>, vector<1x32x64xbf16>
    %292 = vector.shape_cast %291 : vector<1x32x64xbf16> to vector<32x64xbf16>
    %c0_131 = arith.constant 0 : index
    %c0_132 = arith.constant 0 : index
    %c0_133 = arith.constant 0 : index
    %293 = vector.load %arg23[%c0_131, %c0_132, %c0_133] : memref<1x32x64xbf16, #tpu.memory_space<vmem>>, vector<1x32x64xbf16>
    %294 = vector.shape_cast %293 : vector<1x32x64xbf16> to vector<32x64xbf16>
    %c0_134 = arith.constant 0 : index
    %c0_135 = arith.constant 0 : index
    %c0_136 = arith.constant 0 : index
    %295 = vector.load %arg24[%c0_134, %c0_135, %c0_136] : memref<1x1x64xf32, #tpu.memory_space<vmem>>, vector<1x1x64xf32>
    %296 = vector.shape_cast %295 : vector<1x1x64xf32> to vector<1x64xf32>
    %c0_137 = arith.constant 0 : index
    %c0_138 = arith.constant 0 : index
    %c0_139 = arith.constant 0 : index
    %297 = vector.load %arg25[%c0_137, %c0_138, %c0_139] : memref<1x1x64xf32, #tpu.memory_space<vmem>>, vector<1x1x64xf32>
    %298 = vector.shape_cast %297 : vector<1x1x64xf32> to vector<1x64xf32>
    %c0_140 = arith.constant 0 : index
    %c0_141 = arith.constant 0 : index
    %c0_142 = arith.constant 0 : index
    %299 = vector.load %arg26[%c0_140, %c0_141, %c0_142] : memref<1x64x32xbf16, #tpu.memory_space<vmem>>, vector<1x64x32xbf16>
    %300 = vector.shape_cast %299 : vector<1x64x32xbf16> to vector<64x32xbf16>
    %cst_143 = arith.constant dense<0.000000e+00> : vector<16xf32>
    %301 = vector.multi_reduction <add>, %286, %cst_143 [1] : vector<16x32xf32> to vector<16xf32>
    %302 = vector.shape_cast %301 : vector<16xf32> to vector<16x1xf32>
    %cst_144 = arith.constant 3.200000e+01 : f32
    %303 = vector.broadcast %cst_144 : f32 to vector<16x1xf32>
    %304 = arith.divf %302, %303 : vector<16x1xf32>
    %305 = vector.broadcast %304 : vector<16x1xf32> to vector<16x32xf32>
    %306 = arith.subf %286, %305 : vector<16x32xf32>
    %307 = arith.mulf %306, %306 : vector<16x32xf32>
    %cst_145 = arith.constant dense<0.000000e+00> : vector<16xf32>
    %308 = vector.multi_reduction <add>, %307, %cst_145 [1] : vector<16x32xf32> to vector<16xf32>
    %309 = vector.shape_cast %308 : vector<16xf32> to vector<16x1xf32>
    %cst_146 = arith.constant 3.200000e+01 : f32
    %310 = vector.broadcast %cst_146 : f32 to vector<16x1xf32>
    %311 = arith.divf %309, %310 : vector<16x1xf32>
    %312 = vector.broadcast %304 : vector<16x1xf32> to vector<16x32xf32>
    %313 = arith.subf %286, %312 : vector<16x32xf32>
    %cst_147 = arith.constant 9.99999974E-6 : f32
    %314 = vector.broadcast %cst_147 : f32 to vector<16x1xf32>
    %315 = arith.addf %311, %314 : vector<16x1xf32>
    %316 = math.rsqrt %315 : vector<16x1xf32>
    %317 = vector.broadcast %316 : vector<16x1xf32> to vector<16x32xf32>
    %318 = arith.mulf %313, %317 : vector<16x32xf32>
    %319 = vector.broadcast %288 : vector<1x32xf32> to vector<16x32xf32>
    %320 = arith.mulf %318, %319 : vector<16x32xf32>
    %321 = vector.broadcast %290 : vector<1x32xf32> to vector<16x32xf32>
    %322 = arith.addf %320, %321 : vector<16x32xf32>
    %323 = arith.truncf %322 : vector<16x32xf32> to vector<16x32xbf16>
    %cst_148 = arith.constant dense<0.000000e+00> : vector<16x64xf32>
    %324 = tpu.matmul %323, %292, %cst_148 {dimension_numbers = #tpu.dot_dimension_numbers<[1], [0], [0], [1], [0, 0, 1, 1], [], []>} : vector<16x32xbf16>, vector<32x64xbf16>, vector<16x64xf32> -> vector<16x64xf32>
    %cst_149 = arith.constant dense<0.000000e+00> : vector<16x64xf32>
    %325 = tpu.matmul %323, %294, %cst_149 {dimension_numbers = #tpu.dot_dimension_numbers<[1], [0], [0], [1], [0, 0, 1, 1], [], []>} : vector<16x32xbf16>, vector<32x64xbf16>, vector<16x64xf32> -> vector<16x64xf32>
    %cst_150 = arith.constant 5.000000e-01 : f32
    %326 = vector.broadcast %cst_150 : f32 to vector<16x64xf32>
    %327 = arith.mulf %326, %324 : vector<16x64xf32>
    %cst_151 = arith.constant 0.707106769 : f32
    %328 = vector.broadcast %cst_151 : f32 to vector<16x64xf32>
    %329 = arith.mulf %324, %328 : vector<16x64xf32>
    %330 = math.erf %329 : vector<16x64xf32>
    %cst_152 = arith.constant 1.000000e+00 : f32
    %331 = vector.broadcast %cst_152 : f32 to vector<16x64xf32>
    %332 = arith.addf %331, %330 : vector<16x64xf32>
    %333 = arith.mulf %327, %332 : vector<16x64xf32>
    %334 = arith.mulf %333, %325 : vector<16x64xf32>
    %cst_153 = arith.constant dense<0.000000e+00> : vector<16xf32>
    %335 = vector.multi_reduction <add>, %334, %cst_153 [1] : vector<16x64xf32> to vector<16xf32>
    %336 = vector.shape_cast %335 : vector<16xf32> to vector<16x1xf32>
    %cst_154 = arith.constant 6.400000e+01 : f32
    %337 = vector.broadcast %cst_154 : f32 to vector<16x1xf32>
    %338 = arith.divf %336, %337 : vector<16x1xf32>
    %339 = vector.broadcast %338 : vector<16x1xf32> to vector<16x64xf32>
    %340 = arith.subf %334, %339 : vector<16x64xf32>
    %341 = arith.mulf %340, %340 : vector<16x64xf32>
    %cst_155 = arith.constant dense<0.000000e+00> : vector<16xf32>
    %342 = vector.multi_reduction <add>, %341, %cst_155 [1] : vector<16x64xf32> to vector<16xf32>
    %343 = vector.shape_cast %342 : vector<16xf32> to vector<16x1xf32>
    %cst_156 = arith.constant 6.400000e+01 : f32
    %344 = vector.broadcast %cst_156 : f32 to vector<16x1xf32>
    %345 = arith.divf %343, %344 : vector<16x1xf32>
    %346 = vector.broadcast %338 : vector<16x1xf32> to vector<16x64xf32>
    %347 = arith.subf %334, %346 : vector<16x64xf32>
    %cst_157 = arith.constant 9.99999974E-6 : f32
    %348 = vector.broadcast %cst_157 : f32 to vector<16x1xf32>
    %349 = arith.addf %345, %348 : vector<16x1xf32>
    %350 = math.rsqrt %349 : vector<16x1xf32>
    %351 = vector.broadcast %350 : vector<16x1xf32> to vector<16x64xf32>
    %352 = arith.mulf %347, %351 : vector<16x64xf32>
    %353 = vector.broadcast %296 : vector<1x64xf32> to vector<16x64xf32>
    %354 = arith.mulf %352, %353 : vector<16x64xf32>
    %355 = vector.broadcast %298 : vector<1x64xf32> to vector<16x64xf32>
    %356 = arith.addf %354, %355 : vector<16x64xf32>
    %357 = arith.truncf %356 : vector<16x64xf32> to vector<16x64xbf16>
    %cst_158 = arith.constant dense<0.000000e+00> : vector<16x32xf32>
    %358 = tpu.matmul %357, %300, %cst_158 {dimension_numbers = #tpu.dot_dimension_numbers<[1], [0], [0], [1], [0, 0, 1, 1], [], []>} : vector<16x64xbf16>, vector<64x32xbf16>, vector<16x32xf32> -> vector<16x32xf32>
    %359 = arith.addf %286, %358 : vector<16x32xf32>
    %c0_159 = arith.constant 0 : index
    %c0_160 = arith.constant 0 : index
    %360 = vector.load %arg30[%c0_159, %c0_160] : memref<16x32xf32, #tpu.memory_space<vmem>>, vector<16x32xf32>
    tpu.vector_store %arg30[%c0_159, %c0_160], %359 {strides = array<i32>} : memref<16x32xf32, #tpu.memory_space<vmem>>, vector<16x32xf32>,
    %c1_i32 = arith.constant 1 : i32
    %361 = arith.cmpi eq, %arg1, %c1_i32 : i32
    %362 = arith.extui %361 : i1 to i32
    %c0_i32_161 = arith.constant 0 : i32
    %363 = arith.cmpi ne, %362, %c0_i32_161 : i32
    scf.if %363 {
      %c0_162 = arith.constant 0 : index
      %c0_163 = arith.constant 0 : index
      %364 = vector.load %arg27[%c0_162, %c0_163] : memref<1x32xf32, #tpu.memory_space<vmem>>, vector<1x32xf32>
      %c0_164 = arith.constant 0 : index
      %c0_165 = arith.constant 0 : index
      %365 = vector.load %arg28[%c0_164, %c0_165] : memref<1x32xf32, #tpu.memory_space<vmem>>, vector<1x32xf32>
      %cst_166 = arith.constant dense<0.000000e+00> : vector<16xf32>
      %366 = vector.multi_reduction <add>, %359, %cst_166 [1] : vector<16x32xf32> to vector<16xf32>
      %367 = vector.shape_cast %366 : vector<16xf32> to vector<16x1xf32>
      %cst_167 = arith.constant 3.200000e+01 : f32
      %368 = vector.broadcast %cst_167 : f32 to vector<16x1xf32>
      %369 = arith.divf %367, %368 : vector<16x1xf32>
      %370 = vector.broadcast %369 : vector<16x1xf32> to vector<16x32xf32>
      %371 = arith.subf %359, %370 : vector<16x32xf32>
      %372 = arith.mulf %371, %371 : vector<16x32xf32>
      %cst_168 = arith.constant dense<0.000000e+00> : vector<16xf32>
      %373 = vector.multi_reduction <add>, %372, %cst_168 [1] : vector<16x32xf32> to vector<16xf32>
      %374 = vector.shape_cast %373 : vector<16xf32> to vector<16x1xf32>
      %cst_169 = arith.constant 3.200000e+01 : f32
      %375 = vector.broadcast %cst_169 : f32 to vector<16x1xf32>
      %376 = arith.divf %374, %375 : vector<16x1xf32>
      %377 = vector.broadcast %369 : vector<16x1xf32> to vector<16x32xf32>
      %378 = arith.subf %359, %377 : vector<16x32xf32>
      %cst_170 = arith.constant 9.99999974E-6 : f32
      %379 = vector.broadcast %cst_170 : f32 to vector<16x1xf32>
      %380 = arith.addf %376, %379 : vector<16x1xf32>
      %381 = math.rsqrt %380 : vector<16x1xf32>
      %382 = vector.broadcast %381 : vector<16x1xf32> to vector<16x32xf32>
      %383 = arith.mulf %378, %382 : vector<16x32xf32>
      %384 = vector.broadcast %364 : vector<1x32xf32> to vector<16x32xf32>
      %385 = arith.mulf %383, %384 : vector<16x32xf32>
      %386 = vector.broadcast %365 : vector<1x32xf32> to vector<16x32xf32>
      %387 = arith.addf %385, %386 : vector<16x32xf32>
      %c0_171 = arith.constant 0 : index
      %c0_172 = arith.constant 0 : index
      %c0_173 = arith.constant 0 : index
      %388 = vector.load %arg29[%c0_171, %c0_172, %c0_173] : memref<1x16x32xf32, #tpu.memory_space<vmem>>, vector<1x16x32xf32>
      %389 = vector.shape_cast %388 : vector<1x16x32xf32> to vector<16x32xf32>
      %390 = vector.shape_cast %387 : vector<16x32xf32> to vector<1x16x32xf32>
      tpu.vector_store %arg29[%c0_171, %c0_172, %c0_173], %390 {strides = array<i32>} : memref<1x16x32xf32, #tpu.memory_space<vmem>>, vector<1x16x32xf32>,
    } else {
    }
    return
  }
  func.func @transform_0(%arg0: i32, %arg1: i32) -> (i32, i32, i32) {
    %c0_i32 = arith.constant 0 : i32
    %c0_i32_0 = arith.constant 0 : i32
    %c0_i32_1 = arith.constant 0 : i32
    return %arg0, %c0_i32, %c0_i32_0 : i32, i32, i32
  }
  func.func @transform_1(%arg0: i32, %arg1: i32) -> (i32, i32, i32) {
    %c0_i32 = arith.constant 0 : i32
    %c0_i32_0 = arith.constant 0 : i32
    %c0_i32_1 = arith.constant 0 : i32
    return %arg0, %c0_i32, %c0_i32_0 : i32, i32, i32
  }
  func.func @transform_2(%arg0: i32, %arg1: i32) -> (i32, i32, i32) {
    %c0_i32 = arith.constant 0 : i32
    %c0_i32_0 = arith.constant 0 : i32
    %c0_i32_1 = arith.constant 0 : i32
    return %arg0, %c0_i32, %c0_i32_0 : i32, i32, i32
  }
  func.func @transform_3(%arg0: i32, %arg1: i32) -> (i32, i32) {
    %c0_i32 = arith.constant 0 : i32
    %c0_i32_0 = arith.constant 0 : i32
    %c0_i32_1 = arith.constant 0 : i32
    return %c0_i32, %c0_i32_0 : i32, i32
  }
  func.func @transform_4(%arg0: i32, %arg1: i32) -> (i32, i32) {
    %c0_i32 = arith.constant 0 : i32
    %c0_i32_0 = arith.constant 0 : i32
    %c0_i32_1 = arith.constant 0 : i32
    return %c0_i32, %c0_i32_0 : i32, i32
  }
  func.func @transform_5(%arg0: i32, %arg1: i32) -> (i32, i32, i32) {
    %c0_i32 = arith.constant 0 : i32
    %c0_i32_0 = arith.constant 0 : i32
    %c0_i32_1 = arith.constant 0 : i32
    return %arg1, %c0_i32, %c0_i32_0 : i32, i32, i32
  }
  func.func @transform_6(%arg0: i32, %arg1: i32) -> (i32, i32, i32) {
    %c0_i32 = arith.constant 0 : i32
    %c0_i32_0 = arith.constant 0 : i32
    %c0_i32_1 = arith.constant 0 : i32
    return %arg1, %c0_i32, %c0_i32_0 : i32, i32, i32
  }
  func.func @transform_7(%arg0: i32, %arg1: i32) -> (i32, i32, i32) {
    %c0_i32 = arith.constant 0 : i32
    %c0_i32_0 = arith.constant 0 : i32
    %c0_i32_1 = arith.constant 0 : i32
    return %arg1, %c0_i32, %c0_i32_0 : i32, i32, i32
  }
  func.func @transform_8(%arg0: i32, %arg1: i32) -> (i32, i32, i32) {
    %c0_i32 = arith.constant 0 : i32
    %c0_i32_0 = arith.constant 0 : i32
    %c0_i32_1 = arith.constant 0 : i32
    return %arg1, %c0_i32, %c0_i32_0 : i32, i32, i32
  }
  func.func @transform_9(%arg0: i32, %arg1: i32) -> (i32, i32, i32) {
    %c0_i32 = arith.constant 0 : i32
    %c0_i32_0 = arith.constant 0 : i32
    %c0_i32_1 = arith.constant 0 : i32
    return %arg1, %c0_i32, %c0_i32_0 : i32, i32, i32
  }
  func.func @transform_10(%arg0: i32, %arg1: i32) -> (i32, i32, i32) {
    %c0_i32 = arith.constant 0 : i32
    %c0_i32_0 = arith.constant 0 : i32
    %c0_i32_1 = arith.constant 0 : i32
    return %arg1, %c0_i32, %c0_i32_0 : i32, i32, i32
  }
  func.func @transform_11(%arg0: i32, %arg1: i32) -> (i32, i32, i32) {
    %c0_i32 = arith.constant 0 : i32
    %c0_i32_0 = arith.constant 0 : i32
    %c0_i32_1 = arith.constant 0 : i32
    return %arg1, %c0_i32, %c0_i32_0 : i32, i32, i32
  }
  func.func @transform_12(%arg0: i32, %arg1: i32) -> (i32, i32, i32) {
    %c0_i32 = arith.constant 0 : i32
    %c0_i32_0 = arith.constant 0 : i32
    %c0_i32_1 = arith.constant 0 : i32
    return %arg1, %c0_i32, %c0_i32_0 : i32, i32, i32
  }
  func.func @transform_13(%arg0: i32, %arg1: i32) -> (i32, i32, i32) {
    %c0_i32 = arith.constant 0 : i32
    %c0_i32_0 = arith.constant 0 : i32
    %c0_i32_1 = arith.constant 0 : i32
    return %arg1, %c0_i32, %c0_i32_0 : i32, i32, i32
  }
  func.func @transform_14(%arg0: i32, %arg1: i32) -> (i32, i32, i32) {
    %c0_i32 = arith.constant 0 : i32
    %c0_i32_0 = arith.constant 0 : i32
    %c0_i32_1 = arith.constant 0 : i32
    return %arg1, %c0_i32, %c0_i32_0 : i32, i32, i32
  }
  func.func @transform_15(%arg0: i32, %arg1: i32) -> (i32, i32, i32) {
    %c0_i32 = arith.constant 0 : i32
    %c0_i32_0 = arith.constant 0 : i32
    %c0_i32_1 = arith.constant 0 : i32
    return %arg1, %c0_i32, %c0_i32_0 : i32, i32, i32
  }
  func.func @transform_16(%arg0: i32, %arg1: i32) -> (i32, i32, i32) {
    %c0_i32 = arith.constant 0 : i32
    %c0_i32_0 = arith.constant 0 : i32
    %c0_i32_1 = arith.constant 0 : i32
    return %arg1, %c0_i32, %c0_i32_0 : i32, i32, i32
  }
  func.func @transform_17(%arg0: i32, %arg1: i32) -> (i32, i32, i32) {
    %c0_i32 = arith.constant 0 : i32
    %c0_i32_0 = arith.constant 0 : i32
    %c0_i32_1 = arith.constant 0 : i32
    return %arg1, %c0_i32, %c0_i32_0 : i32, i32, i32
  }
  func.func @transform_18(%arg0: i32, %arg1: i32) -> (i32, i32, i32) {
    %c0_i32 = arith.constant 0 : i32
    %c0_i32_0 = arith.constant 0 : i32
    %c0_i32_1 = arith.constant 0 : i32
    return %arg1, %c0_i32, %c0_i32_0 : i32, i32, i32
  }
  func.func @transform_19(%arg0: i32, %arg1: i32) -> (i32, i32, i32) {
    %c0_i32 = arith.constant 0 : i32
    %c0_i32_0 = arith.constant 0 : i32
    %c0_i32_1 = arith.constant 0 : i32
    return %arg1, %c0_i32, %c0_i32_0 : i32, i32, i32
  }
  func.func @transform_20(%arg0: i32, %arg1: i32) -> (i32, i32, i32) {
    %c0_i32 = arith.constant 0 : i32
    %c0_i32_0 = arith.constant 0 : i32
    %c0_i32_1 = arith.constant 0 : i32
    return %arg1, %c0_i32, %c0_i32_0 : i32, i32, i32
  }
  func.func @transform_21(%arg0: i32, %arg1: i32) -> (i32, i32, i32) {
    %c0_i32 = arith.constant 0 : i32
    %c0_i32_0 = arith.constant 0 : i32
    %c0_i32_1 = arith.constant 0 : i32
    return %arg1, %c0_i32, %c0_i32_0 : i32, i32, i32
  }
  func.func @transform_22(%arg0: i32, %arg1: i32) -> (i32, i32, i32) {
    %c0_i32 = arith.constant 0 : i32
    %c0_i32_0 = arith.constant 0 : i32
    %c0_i32_1 = arith.constant 0 : i32
    return %arg1, %c0_i32, %c0_i32_0 : i32, i32, i32
  }
  func.func @transform_23(%arg0: i32, %arg1: i32) -> (i32, i32, i32) {
    %c0_i32 = arith.constant 0 : i32
    %c0_i32_0 = arith.constant 0 : i32
    %c0_i32_1 = arith.constant 0 : i32
    return %arg1, %c0_i32, %c0_i32_0 : i32, i32, i32
  }
  func.func @transform_24(%arg0: i32, %arg1: i32) -> (i32, i32, i32) {
    %c0_i32 = arith.constant 0 : i32
    %c0_i32_0 = arith.constant 0 : i32
    %c0_i32_1 = arith.constant 0 : i32
    return %arg1, %c0_i32, %c0_i32_0 : i32, i32, i32
  }
  func.func @transform_25(%arg0: i32, %arg1: i32) -> (i32, i32) {
    %c0_i32 = arith.constant 0 : i32
    %c0_i32_0 = arith.constant 0 : i32
    %c0_i32_1 = arith.constant 0 : i32
    return %c0_i32, %c0_i32_0 : i32, i32
  }
  func.func @transform_26(%arg0: i32, %arg1: i32) -> (i32, i32) {
    %c0_i32 = arith.constant 0 : i32
    %c0_i32_0 = arith.constant 0 : i32
    %c0_i32_1 = arith.constant 0 : i32
    return %c0_i32, %c0_i32_0 : i32, i32
  }
  func.func @transform_27(%arg0: i32, %arg1: i32) -> (i32, i32, i32) {
    %c0_i32 = arith.constant 0 : i32
    %c0_i32_0 = arith.constant 0 : i32
    %c0_i32_1 = arith.constant 0 : i32
    return %arg0, %c0_i32, %c0_i32_0 : i32, i32, i32
  }
}

</mosaic_0001>

<bundles_post_ra>
// kernel: squeeze.1
= control target key start
LH: loop header
LB: loop body
LE: loop exit
PB: predicated region body
PF: predicated region fallthrough
CT: control target
= control target key end

     0   :  { %vm7_vm0 = vcmask 130048   ;;  %s39_s0 = inlined_call_operand.vmem [shape: s32[32], index: 0, kind: input, shape index: {}]   ;;  %s40_s1 = inlined_call_operand.vmem [shape: s32[2,16], index: 1, kind: output, shape index: {}]  }
   0x1   :  { %v4_v0 = vld [vmem:[%s39_s0] sm:$0x1]  ;;  %s22_s0 = smov 112  }
   0x2   :  { %5 = vst [vmem:[#allocation1] sm:$0x1] %v4_v0 }
   0x9   :  { %v9_v1 = vld [vmem:[#allocation1] sm:$0x1]  }
   0xa   :  { %v6_v2 = vld [vmem:[#allocation1] sm:$0x1]   ;;  %10 = vrot.lane.b32.xlu0 %v9_v1, %s22_s0 }
   0xb   :  { %8 = vst.msk [vmem:[#allocation0] sm:$0x1] %vm7_vm0, %v6_v2  }
  0x7c   :  { %v11_v3 = vpop.permute.xlu0 %10  }
  0x7d   :  { %14 = vst.msk [vmem:[#allocation0 + $0x1] sm:$0x1] %vm7_vm0, %v11_v3  }
  0x84   :  { %v18_v4 = vld [vmem:[#allocation0] sm:$0x3] }
  0x85   :  { %20 = vst [vmem:[%s40_s1] sm:$0x3] %v18_v4 }

</bundles_post_ra>
